<compile_context>
chip_gen: v7x
topology: tpu7x:2x2x1
jax: 0.10.0
libtpu: 0.0.40
codegen_flags: <defaults>
</compile_context>

<pallas_src>
import jax
import jax.numpy as jnp
from jax.experimental import pallas as pl
from jax.experimental.pallas import tpu as pltpu

# ----------------------------- sizes (small, synthetic) ---------------------
B = 2            # batch
S = 8            # sequence length
H = 32           # hidden size
NH = 4           # attention heads
HD = H // NH     # head dim
FF = 4 * H       # FFN inner dim
V = 64           # vocab size
NUM_LABELS = 2   # args.num_labels
NUM_LANGS = 5    # lang classifier output size (fixed to 5 in the module)
LN_EPS = 1e-12
SCALE = 1.0 / float(HD) ** 0.5

HEAD_OUT = NUM_LABELS + NUM_LANGS        # 7  -> [logits | lang]
ATTN_W = NH * B * S                      # 64 lane-width of packed attn rows
OUT_ROWS = B + S                         # 10 rows in the output slab
LANES = 128


def _layer_norm(x, g, b):
    mu = jnp.mean(x, axis=-1, keepdims=True)
    var = jnp.mean((x - mu) ** 2, axis=-1, keepdims=True)
    return (x - mu) * jax.lax.rsqrt(var + LN_EPS) * g + b


# ----------------------------- fused kernel ---------------------------------
def fused_kernel(x_ref, mask_ref, wa_ref, wb_ref, bias_ref, out_ref):
    x2 = x_ref[...]                                   # [B*S, H]  f32
    mask = mask_ref[...]                              # [B, S]    f32

    # ---- static slices of the packed parameter slabs (zero-cost views) ----
    w_qkv = wa_ref[:, 0:3 * H]                        # [H, 3H]   Wq|Wk|Wv
    w_o = wa_ref[:, 3 * H:4 * H]                      # [H, H]
    w_f1 = wa_ref[:, 4 * H:4 * H + FF]                # [H, FF]
    w_h1 = wa_ref[:, 4 * H + FF:4 * H + FF + LANES]   # [H, 128]  Wc1|Wl1|0
    w_f2 = wb_ref[:, 0:H]                             # [FF, H]
    w_h2 = wb_ref[:, H:H + HEAD_OUT]                  # [128, 7]  blockdiag(Wc2,Wl2)

    b_qkv = bias_ref[0:1, 0:3 * H]
    b_o = bias_ref[1:2, 0:H]
    ln1_g = bias_ref[2:3, 0:H]
    ln1_b = bias_ref[3:4, 0:H]
    b_f1 = bias_ref[4:5, 0:FF]
    b_f2 = bias_ref[5:6, 0:H]
    ln2_g = bias_ref[6:7, 0:H]
    ln2_b = bias_ref[7:8, 0:H]
    b_h1 = bias_ref[8:9, :]                           # [1, 128]  bc1|bl1|0
    b_h2 = bias_ref[9:10, 0:HEAD_OUT]                 # [1, 7]    bc2|bl2

    # ---- fused QKV projection: one MXU matmul instead of three ----
    qkv = jnp.dot(x2, w_qkv, preferred_element_type=jnp.float32) + b_qkv   # [B*S, 3H]
    q3 = qkv[:, 0:H].reshape(B, S, H)
    k3 = qkv[:, H:2 * H].reshape(B, S, H)
    v3 = qkv[:, 2 * H:3 * H].reshape(B, S, H)

    # ---- all heads batched into a single einsum pair (batch axis i=h*B+b) --
    qh = jnp.concatenate([q3[:, :, h * HD:(h + 1) * HD] for h in range(NH)], axis=0)
    kh = jnp.concatenate([k3[:, :, h * HD:(h + 1) * HD] for h in range(NH)], axis=0)
    vh = jnp.concatenate([v3[:, :, h * HD:(h + 1) * HD] for h in range(NH)], axis=0)

    neg_b = ((mask - 1.0) * 1e9)[:, None, :]          # [B,1,S]  0 kept / -1e9 pad
    neg = jnp.concatenate([neg_b] * NH, axis=0)       # [NH*B,1,S]

    s = jnp.einsum('iqd,ikd->iqk', qh, kh,
                   preferred_element_type=jnp.float32) * SCALE + neg
    s = s - jnp.max(s, axis=-1, keepdims=True)
    e = jnp.exp(s)
    p = e * pl.reciprocal(jnp.sum(e, axis=-1, keepdims=True), approx=True)  # [NH*B,S,S]
    ctx = jnp.einsum('iqk,ikd->iqd', p, vh,
                     preferred_element_type=jnp.float32)                     # [NH*B,S,HD]

    # merge heads back to [B*S, H] (head-major columns)
    ctx3 = jnp.concatenate([ctx[h * B:(h + 1) * B] for h in range(NH)], axis=-1)  # [B,S,H]
    ctx2 = ctx3.reshape(B * S, H)

    # ---- attention output projection + residual + LayerNorm (post-LN) ----
    ao = jnp.dot(ctx2, w_o, preferred_element_type=jnp.float32) + b_o
    h1 = _layer_norm(x2 + ao, ln1_g, ln1_b)

    # ---- FFN + residual + LayerNorm ----
    f = jnp.dot(h1, w_f1, preferred_element_type=jnp.float32) + b_f1
    # TODO(synk): HF BERT default gelu is the exact erf form; tanh approx used here.
    f = jax.nn.gelu(f, approximate=True)
    f = jnp.dot(f, w_f2, preferred_element_type=jnp.float32) + b_f2
    h2 = _layer_norm(h1 + f, ln2_g, ln2_b)            # last_hidden_state [B*S, H]

    # ---- masked mean pooling (clamp(sum_mask, 1e-9), like torch) ----
    h3 = h2.reshape(B, S, H)
    mm = mask[:, :, None]                             # [B,S,1]
    summed = jnp.sum(h3 * mm, axis=1)                 # [B,H]
    denom = jnp.maximum(jnp.sum(mm, axis=1), 1e-9)    # [B,1]
    pooled = summed * pl.reciprocal(denom, approx=True)

    # TODO(synk): torch.nn.Dropout applied as identity (inference semantics).
    features = pooled

    # ---- fused classifier + language-adversarial heads ----
    # t[:,0:32]=tanh(pooled@Wc1+bc1), t[:,32:64]=tanh(pooled@Wl1+bl1), rest 0
    t = jnp.tanh(jnp.dot(features, w_h1, preferred_element_type=jnp.float32) + b_h1)
    out7 = jnp.dot(t, w_h2, preferred_element_type=jnp.float32) + b_h2   # [B,7]=[logits|lang]

    # ---- single lane-dense (OUT_ROWS, 128) output slab ----
    head_rows = jnp.concatenate(
        [features, out7,
         jnp.zeros((B, LANES - H - HEAD_OUT), jnp.float32)], axis=-1)     # [B,128]
    attn_wide = jnp.concatenate([p[i] for i in range(NH * B)], axis=-1)   # [S, NH*B*S]
    attn_rows = jnp.concatenate(
        [attn_wide, jnp.zeros((S, LANES - ATTN_W), jnp.float32)], axis=-1)  # [S,128]
    out_ref[...] = jnp.concatenate([head_rows, attn_rows], axis=0)        # [10,128]


# ----------------------------- pallas_call wrapper ---------------------------
def run_fused(x2, mask, w_a, w_b, bias):
    vmem = lambda: pl.BlockSpec(memory_space=pltpu.MemorySpace.VMEM)
    return pl.pallas_call(
        fused_kernel,
        out_shape=jax.ShapeDtypeStruct((OUT_ROWS, LANES), jnp.float32),
        in_specs=[vmem() for _ in range(5)],
        out_specs=vmem(),
    )(x2, mask, w_a, w_b, bias)


# ----------------------------- parameters ------------------------------------
def init_params(key):
    ks = jax.random.split(key, 12)

    def w(k, shape):
        return (0.02 * jax.random.normal(k, shape)).astype(jnp.float32)

    z = lambda *shape: jnp.zeros(shape, jnp.float32)
    o = lambda *shape: jnp.ones(shape, jnp.float32)
    return dict(
        word_emb=w(ks[0], (V, H)), pos_emb=w(ks[1], (S, H)),
        wq=w(ks[2], (H, H)), bq=z(H),
        wk=w(ks[3], (H, H)), bk=z(H),
        wv=w(ks[4], (H, H)), bv=z(H),
        wo=w(ks[5], (H, H)), bo=z(H),
        ln1_g=o(H), ln1_b=z(H),
        wf1=w(ks[6], (H, FF)), bf1=z(FF),
        wf2=w(ks[7], (FF, H)), bf2=z(H),
        ln2_g=o(H), ln2_b=z(H),
        wc1=w(ks[8], (H, H)), bc1=z(H),                 # classifier head (self.linear)
        wc2=w(ks[9], (H, NUM_LABELS)), bc2=z(NUM_LABELS),
        wl1=w(ks[10], (H, H)), bl1=z(H),                # lang-adversarial head
        wl2=w(ks[11], (H, NUM_LANGS)), bl2=z(NUM_LANGS),
    )


def pack_params(p):
    """Pack the tiny per-tensor weights into 3 contiguous slabs (one DMA each)."""
    # slab A [H, 384] = [Wq|Wk|Wv (96) | Wo (32) | Wf1 (128) | Wc1|Wl1|0 (128)]
    w_h1_pad = jnp.concatenate(
        [p['wc1'], p['wl1'], jnp.zeros((H, LANES - 2 * H), jnp.float32)], axis=1)
    w_a = jnp.concatenate(
        [p['wq'], p['wk'], p['wv'], p['wo'], p['wf1'], w_h1_pad], axis=1)

    # slab B [FF, 39] = [Wf2 (128x32) | blockdiag(Wc2, Wl2) (128x7)]
    w2 = jnp.zeros((FF, HEAD_OUT), jnp.float32)
    w2 = w2.at[0:H, 0:NUM_LABELS].set(p['wc2'])
    w2 = w2.at[H:2 * H, NUM_LABELS:].set(p['wl2'])
    w_b = jnp.concatenate([p['wf2'], w2], axis=1)

    def row(*vecs):
        v = jnp.concatenate([jnp.asarray(x, jnp.float32).reshape(-1) for x in vecs])
        return jnp.pad(v, (0, LANES - v.shape[0])).reshape(1, LANES)

    bias = jnp.concatenate([
        row(p['bq'], p['bk'], p['bv']),   # 0: b_qkv
        row(p['bo']),                      # 1
        row(p['ln1_g']),                   # 2
        row(p['ln1_b']),                   # 3
        row(p['bf1']),                     # 4
        row(p['bf2']),                     # 5
        row(p['ln2_g']),                   # 6
        row(p['ln2_b']),                   # 7
        row(p['bc1'], p['bl1']),           # 8: fused head bias 1 (padded)
        row(p['bc2'], p['bl2']),           # 9: fused head bias 2
    ], axis=0)                             # [10, 128]

    return dict(word_emb=p['word_emb'], pos_emb=p['pos_emb'],
                w_a=w_a, w_b=w_b, bias=bias)


# ----------------------------- forward ---------------------------------------
def forward(packed, input_id, attention_mask):
    # matches: input_id.squeeze(dim=1), attention_mask.squeeze(dim=1)
    input_id = jnp.squeeze(input_id, axis=1)                         # [B,S] int32
    attention_mask = jnp.squeeze(attention_mask, axis=1).astype(jnp.float32)

    # embedding lookup (XLA glue gather) + learned positions, flattened to 2-D
    x_emb = packed['word_emb'][input_id] + packed['pos_emb'][None, :, :]
    x2 = x_emb.reshape(B * S, H).astype(jnp.float32)

    out = run_fused(x2, attention_mask, packed['w_a'], packed['w_b'], packed['bias'])

    # decode the lane-dense output slab (pure layout plumbing in XLA)
    features = out[0:B, 0:H]                                         # [B,H]
    logits = out[0:B, H:H + NUM_LABELS]                              # [B,2]
    lang_logits = out[0:B, H + NUM_LABELS:H + NUM_LABELS + NUM_LANGS]  # [B,5]
    attn = (out[B:B + S, 0:ATTN_W]
            .reshape(S, NH, B, S)
            .transpose(2, 1, 0, 3))                                  # [B,NH,S,S]
    attentions = (attn,)   # tuple of per-layer attentions (1 layer)

    # predictions = softmax(logits, dim=1).flatten(); predictions[1] - predictions[0]
    probs = jax.nn.softmax(logits, axis=1)
    flat = probs.reshape(-1)
    predictions = flat[1] - flat[0]

    return predictions, logits, attentions, lang_logits, features


if __name__ == "__main__":
    key = jax.random.PRNGKey(0)
    pkey, ikey = jax.random.split(key)
    params = init_params(pkey)
    packed = pack_params(params)

    # inputs mimic the torch module: [B, 1, S] before squeeze(dim=1)
    input_id = jax.random.randint(ikey, (B, 1, S), 0, V, dtype=jnp.int32)
    attention_mask = jnp.concatenate(
        [jnp.ones((1, 1, S), jnp.float32),
         jnp.concatenate([jnp.ones((1, 1, S - 3), jnp.float32),
                          jnp.zeros((1, 1, 3), jnp.float32)], axis=-1)],
        axis=0)

    out = jax.jit(forward)(packed, input_id, attention_mask)
    out = jax.block_until_ready(out)

    predictions, logits, attentions, lang_logits, features = out
    assert logits.shape == (B, NUM_LABELS)
    assert lang_logits.shape == (B, NUM_LANGS)
    assert features.shape == (B, H)
    assert attentions[0].shape == (B, NH, S, S)
    assert predictions.shape == ()
    print("KERNEL_OK")
</pallas_src>

<mosaic_0001>
module attributes {stable_mosaic.version = 11 : i64} {
  func.func @fused_kernel(%arg0: memref<16x32xf32, #tpu.memory_space<vmem>>, %arg1: memref<2x8xf32, #tpu.memory_space<vmem>>, %arg2: memref<32x384xf32, #tpu.memory_space<vmem>>, %arg3: memref<128x39xf32, #tpu.memory_space<vmem>>, %arg4: memref<10x128xf32, #tpu.memory_space<vmem>>, %arg5: memref<10x128xf32, #tpu.memory_space<vmem>>) attributes {dimension_semantics = [], scalar_prefetch = 0 : i64, scratch_operands = 0 : i64, tpu.core_type = #tpu.core_type<tc>} {
    %c0 = arith.constant 0 : index
    %c0_0 = arith.constant 0 : index
    %0 = vector.load %arg0[%c0, %c0_0] : memref<16x32xf32, #tpu.memory_space<vmem>>, vector<16x32xf32>
    %c0_1 = arith.constant 0 : index
    %c0_2 = arith.constant 0 : index
    %1 = vector.load %arg1[%c0_1, %c0_2] : memref<2x8xf32, #tpu.memory_space<vmem>>, vector<2x8xf32>
    %c0_3 = arith.constant 0 : index
    %c0_4 = arith.constant 0 : index
    %2 = vector.load %arg2[%c0_3, %c0_4] : memref<32x384xf32, #tpu.memory_space<vmem>>, vector<32x96xf32>
    %c0_5 = arith.constant 0 : index
    %c96 = arith.constant 96 : index
    %3 = vector.load %arg2[%c0_5, %c96] : memref<32x384xf32, #tpu.memory_space<vmem>>, vector<32x32xf32>
    %c0_6 = arith.constant 0 : index
    %c128 = arith.constant 128 : index
    %4 = vector.load %arg2[%c0_6, %c128] : memref<32x384xf32, #tpu.memory_space<vmem>>, vector<32x128xf32>
    %c0_7 = arith.constant 0 : index
    %c256 = arith.constant 256 : index
    %5 = vector.load %arg2[%c0_7, %c256] : memref<32x384xf32, #tpu.memory_space<vmem>>, vector<32x128xf32>
    %c0_8 = arith.constant 0 : index
    %c0_9 = arith.constant 0 : index
    %6 = vector.load %arg3[%c0_8, %c0_9] : memref<128x39xf32, #tpu.memory_space<vmem>>, vector<128x32xf32>
    %c0_10 = arith.constant 0 : index
    %c32 = arith.constant 32 : index
    %7 = vector.load %arg3[%c0_10, %c32] : memref<128x39xf32, #tpu.memory_space<vmem>>, vector<128x7xf32>
    %c0_11 = arith.constant 0 : index
    %c0_12 = arith.constant 0 : index
    %8 = vector.load %arg4[%c0_11, %c0_12] : memref<10x128xf32, #tpu.memory_space<vmem>>, vector<1x96xf32>
    %c1 = arith.constant 1 : index
    %c0_13 = arith.constant 0 : index
    %9 = vector.load %arg4[%c1, %c0_13] : memref<10x128xf32, #tpu.memory_space<vmem>>, vector<1x32xf32>
    %c2 = arith.constant 2 : index
    %c0_14 = arith.constant 0 : index
    %10 = vector.load %arg4[%c2, %c0_14] : memref<10x128xf32, #tpu.memory_space<vmem>>, vector<1x32xf32>
    %c3 = arith.constant 3 : index
    %c0_15 = arith.constant 0 : index
    %11 = vector.load %arg4[%c3, %c0_15] : memref<10x128xf32, #tpu.memory_space<vmem>>, vector<1x32xf32>
    %c4 = arith.constant 4 : index
    %c0_16 = arith.constant 0 : index
    %12 = vector.load %arg4[%c4, %c0_16] : memref<10x128xf32, #tpu.memory_space<vmem>>, vector<1x128xf32>
    %c5 = arith.constant 5 : index
    %c0_17 = arith.constant 0 : index
    %13 = vector.load %arg4[%c5, %c0_17] : memref<10x128xf32, #tpu.memory_space<vmem>>, vector<1x32xf32>
    %c6 = arith.constant 6 : index
    %c0_18 = arith.constant 0 : index
    %14 = vector.load %arg4[%c6, %c0_18] : memref<10x128xf32, #tpu.memory_space<vmem>>, vector<1x32xf32>
    %c7 = arith.constant 7 : index
    %c0_19 = arith.constant 0 : index
    %15 = vector.load %arg4[%c7, %c0_19] : memref<10x128xf32, #tpu.memory_space<vmem>>, vector<1x32xf32>
    %c8 = arith.constant 8 : index
    %c0_20 = arith.constant 0 : index
    %16 = vector.load %arg4[%c8, %c0_20] : memref<10x128xf32, #tpu.memory_space<vmem>>, vector<1x128xf32>
    %c9 = arith.constant 9 : index
    %c0_21 = arith.constant 0 : index
    %17 = vector.load %arg4[%c9, %c0_21] : memref<10x128xf32, #tpu.memory_space<vmem>>, vector<1x7xf32>
    %cst = arith.constant dense<0.000000e+00> : vector<16x96xf32>
    %18 = tpu.matmul %0, %2, %cst {dimension_numbers = #tpu.dot_dimension_numbers<[1], [0], [0], [1], [0, 0, 1, 1], [], []>} : vector<16x32xf32>, vector<32x96xf32>, vector<16x96xf32> -> vector<16x96xf32>
    %19 = vector.broadcast %8 : vector<1x96xf32> to vector<16x96xf32>
    %20 = arith.addf %18, %19 : vector<16x96xf32>
    %21 = vector.extract_strided_slice %20 {offsets = [0, 0], sizes = [16, 32], strides = [1, 1]} : vector<16x96xf32> to vector<16x32xf32>
    %22 = vector.shape_cast %21 : vector<16x32xf32> to vector<2x8x32xf32>
    %23 = vector.extract_strided_slice %20 {offsets = [0, 32], sizes = [16, 32], strides = [1, 1]} : vector<16x96xf32> to vector<16x32xf32>
    %24 = vector.shape_cast %23 : vector<16x32xf32> to vector<2x8x32xf32>
    %25 = vector.extract_strided_slice %20 {offsets = [0, 64], sizes = [16, 32], strides = [1, 1]} : vector<16x96xf32> to vector<16x32xf32>
    %26 = vector.shape_cast %25 : vector<16x32xf32> to vector<2x8x32xf32>
    %27 = vector.extract_strided_slice %22 {offsets = [0, 0, 0], sizes = [2, 8, 8], strides = [1, 1, 1]} : vector<2x8x32xf32> to vector<2x8x8xf32>
    %28 = vector.extract_strided_slice %22 {offsets = [0, 0, 8], sizes = [2, 8, 8], strides = [1, 1, 1]} : vector<2x8x32xf32> to vector<2x8x8xf32>
    %29 = vector.extract_strided_slice %22 {offsets = [0, 0, 16], sizes = [2, 8, 8], strides = [1, 1, 1]} : vector<2x8x32xf32> to vector<2x8x8xf32>
    %30 = vector.extract_strided_slice %22 {offsets = [0, 0, 24], sizes = [2, 8, 8], strides = [1, 1, 1]} : vector<2x8x32xf32> to vector<2x8x8xf32>
    %31 = tpu.concatenate %27, %28, %29, %30 in 0 : vector<2x8x8xf32>, vector<2x8x8xf32>, vector<2x8x8xf32>, vector<2x8x8xf32> -> vector<8x8x8xf32>
    %32 = vector.extract_strided_slice %24 {offsets = [0, 0, 0], sizes = [2, 8, 8], strides = [1, 1, 1]} : vector<2x8x32xf32> to vector<2x8x8xf32>
    %33 = vector.extract_strided_slice %24 {offsets = [0, 0, 8], sizes = [2, 8, 8], strides = [1, 1, 1]} : vector<2x8x32xf32> to vector<2x8x8xf32>
    %34 = vector.extract_strided_slice %24 {offsets = [0, 0, 16], sizes = [2, 8, 8], strides = [1, 1, 1]} : vector<2x8x32xf32> to vector<2x8x8xf32>
    %35 = vector.extract_strided_slice %24 {offsets = [0, 0, 24], sizes = [2, 8, 8], strides = [1, 1, 1]} : vector<2x8x32xf32> to vector<2x8x8xf32>
    %36 = tpu.concatenate %32, %33, %34, %35 in 0 : vector<2x8x8xf32>, vector<2x8x8xf32>, vector<2x8x8xf32>, vector<2x8x8xf32> -> vector<8x8x8xf32>
    %37 = vector.extract_strided_slice %26 {offsets = [0, 0, 0], sizes = [2, 8, 8], strides = [1, 1, 1]} : vector<2x8x32xf32> to vector<2x8x8xf32>
    %38 = vector.extract_strided_slice %26 {offsets = [0, 0, 8], sizes = [2, 8, 8], strides = [1, 1, 1]} : vector<2x8x32xf32> to vector<2x8x8xf32>
    %39 = vector.extract_strided_slice %26 {offsets = [0, 0, 16], sizes = [2, 8, 8], strides = [1, 1, 1]} : vector<2x8x32xf32> to vector<2x8x8xf32>
    %40 = vector.extract_strided_slice %26 {offsets = [0, 0, 24], sizes = [2, 8, 8], strides = [1, 1, 1]} : vector<2x8x32xf32> to vector<2x8x8xf32>
    %41 = tpu.concatenate %37, %38, %39, %40 in 0 : vector<2x8x8xf32>, vector<2x8x8xf32>, vector<2x8x8xf32>, vector<2x8x8xf32> -> vector<8x8x8xf32>
    %cst_22 = arith.constant 1.000000e+00 : f32
    %42 = vector.broadcast %cst_22 : f32 to vector<2x8xf32>
    %43 = arith.subf %1, %42 : vector<2x8xf32>
    %cst_23 = arith.constant 1.000000e+09 : f32
    %44 = vector.broadcast %cst_23 : f32 to vector<2x8xf32>
    %45 = arith.mulf %43, %44 : vector<2x8xf32>
    %46 = vector.shape_cast %45 : vector<2x8xf32> to vector<2x1x8xf32>
    %47 = tpu.concatenate %46, %46, %46, %46 in 0 : vector<2x1x8xf32>, vector<2x1x8xf32>, vector<2x1x8xf32>, vector<2x1x8xf32> -> vector<8x1x8xf32>
    "tpu.trace_start"() <{level = 10 : i32, message = "iqd,ikd->iqk"}> : () -> ()
    %cst_24 = arith.constant dense<0.000000e+00> : vector<8x8x8xf32>
    %48 = tpu.matmul %31, %36, %cst_24 {dimension_numbers = #tpu.dot_dimension_numbers<[2], [2], [1], [1], [0, 0, 0, 1, 1, 1], [0], [0]>} : vector<8x8x8xf32>, vector<8x8x8xf32>, vector<8x8x8xf32> -> vector<8x8x8xf32>
    "tpu.trace_stop"() : () -> ()
    %cst_25 = arith.constant 0.353553385 : f32
    %49 = vector.broadcast %cst_25 : f32 to vector<8x8x8xf32>
    %50 = arith.mulf %48, %49 : vector<8x8x8xf32>
    %51 = vector.broadcast %47 : vector<8x1x8xf32> to vector<8x8x8xf32>
    %52 = arith.addf %50, %51 : vector<8x8x8xf32>
    %cst_26 = arith.constant dense<0xFF800000> : vector<8x8xf32>
    %53 = vector.multi_reduction <maximumf>, %52, %cst_26 [2] : vector<8x8x8xf32> to vector<8x8xf32>
    %54 = vector.shape_cast %53 : vector<8x8xf32> to vector<8x8x1xf32>
    %55 = vector.broadcast %54 : vector<8x8x1xf32> to vector<8x8x8xf32>
    %56 = arith.subf %52, %55 : vector<8x8x8xf32>
    %57 = math.exp %56 : vector<8x8x8xf32>
    %cst_27 = arith.constant dense<0.000000e+00> : vector<8x8xf32>
    %58 = vector.multi_reduction <add>, %57, %cst_27 [2] : vector<8x8x8xf32> to vector<8x8xf32>
    %59 = vector.shape_cast %58 : vector<8x8xf32> to vector<8x8x1xf32>
    %60 = tpu.reciprocal %59 {approx = true} : vector<8x8x1xf32> -> vector<8x8x1xf32>
    %61 = vector.broadcast %60 : vector<8x8x1xf32> to vector<8x8x8xf32>
    %62 = arith.mulf %57, %61 : vector<8x8x8xf32>
    "tpu.trace_start"() <{level = 10 : i32, message = "iqk,ikd->iqd"}> : () -> ()
    %cst_28 = arith.constant dense<0.000000e+00> : vector<8x8x8xf32>
    %63 = tpu.matmul %62, %41, %cst_28 {dimension_numbers = #tpu.dot_dimension_numbers<[2], [1], [1], [2], [0, 0, 0, 1, 1, 2], [0], [0]>} : vector<8x8x8xf32>, vector<8x8x8xf32>, vector<8x8x8xf32> -> vector<8x8x8xf32>
    "tpu.trace_stop"() : () -> ()
    %64 = vector.extract_strided_slice %63 {offsets = [0, 0, 0], sizes = [2, 8, 8], strides = [1, 1, 1]} : vector<8x8x8xf32> to vector<2x8x8xf32>
    %65 = vector.extract_strided_slice %63 {offsets = [2, 0, 0], sizes = [2, 8, 8], strides = [1, 1, 1]} : vector<8x8x8xf32> to vector<2x8x8xf32>
    %66 = vector.extract_strided_slice %63 {offsets = [4, 0, 0], sizes = [2, 8, 8], strides = [1, 1, 1]} : vector<8x8x8xf32> to vector<2x8x8xf32>
    %67 = vector.extract_strided_slice %63 {offsets = [6, 0, 0], sizes = [2, 8, 8], strides = [1, 1, 1]} : vector<8x8x8xf32> to vector<2x8x8xf32>
    %68 = tpu.concatenate %64, %65, %66, %67 in 2 : vector<2x8x8xf32>, vector<2x8x8xf32>, vector<2x8x8xf32>, vector<2x8x8xf32> -> vector<2x8x32xf32>
    %69 = vector.shape_cast %68 : vector<2x8x32xf32> to vector<16x32xf32>
    %cst_29 = arith.constant dense<0.000000e+00> : vector<16x32xf32>
    %70 = tpu.matmul %69, %3, %cst_29 {dimension_numbers = #tpu.dot_dimension_numbers<[1], [0], [0], [1], [0, 0, 1, 1], [], []>} : vector<16x32xf32>, vector<32x32xf32>, vector<16x32xf32> -> vector<16x32xf32>
    %71 = vector.broadcast %9 : vector<1x32xf32> to vector<16x32xf32>
    %72 = arith.addf %70, %71 : vector<16x32xf32>
    %73 = arith.addf %0, %72 : vector<16x32xf32>
    %cst_30 = arith.constant dense<0.000000e+00> : vector<16xf32>
    %74 = vector.multi_reduction <add>, %73, %cst_30 [1] : vector<16x32xf32> to vector<16xf32>
    %75 = vector.shape_cast %74 : vector<16xf32> to vector<16x1xf32>
    %cst_31 = arith.constant 3.200000e+01 : f32
    %76 = vector.broadcast %cst_31 : f32 to vector<16x1xf32>
    %77 = arith.divf %75, %76 : vector<16x1xf32>
    %78 = vector.broadcast %77 : vector<16x1xf32> to vector<16x32xf32>
    %79 = arith.subf %73, %78 : vector<16x32xf32>
    %80 = arith.mulf %79, %79 : vector<16x32xf32>
    %cst_32 = arith.constant dense<0.000000e+00> : vector<16xf32>
    %81 = vector.multi_reduction <add>, %80, %cst_32 [1] : vector<16x32xf32> to vector<16xf32>
    %82 = vector.shape_cast %81 : vector<16xf32> to vector<16x1xf32>
    %cst_33 = arith.constant 3.200000e+01 : f32
    %83 = vector.broadcast %cst_33 : f32 to vector<16x1xf32>
    %84 = arith.divf %82, %83 : vector<16x1xf32>
    %85 = vector.broadcast %77 : vector<16x1xf32> to vector<16x32xf32>
    %86 = arith.subf %73, %85 : vector<16x32xf32>
    %cst_34 = arith.constant 9.99999996E-13 : f32
    %87 = vector.broadcast %cst_34 : f32 to vector<16x1xf32>
    %88 = arith.addf %84, %87 : vector<16x1xf32>
    %89 = math.rsqrt %88 : vector<16x1xf32>
    %90 = vector.broadcast %89 : vector<16x1xf32> to vector<16x32xf32>
    %91 = arith.mulf %86, %90 : vector<16x32xf32>
    %92 = vector.broadcast %10 : vector<1x32xf32> to vector<16x32xf32>
    %93 = arith.mulf %91, %92 : vector<16x32xf32>
    %94 = vector.broadcast %11 : vector<1x32xf32> to vector<16x32xf32>
    %95 = arith.addf %93, %94 : vector<16x32xf32>
    %cst_35 = arith.constant dense<0.000000e+00> : vector<16x128xf32>
    %96 = tpu.matmul %95, %4, %cst_35 {dimension_numbers = #tpu.dot_dimension_numbers<[1], [0], [0], [1], [0, 0, 1, 1], [], []>} : vector<16x32xf32>, vector<32x128xf32>, vector<16x128xf32> -> vector<16x128xf32>
    %97 = vector.broadcast %12 : vector<1x128xf32> to vector<16x128xf32>
    %98 = arith.addf %96, %97 : vector<16x128xf32>
    %99 = arith.mulf %98, %98 : vector<16x128xf32>
    %100 = arith.mulf %98, %99 : vector<16x128xf32>
    %cst_36 = arith.constant 4.471500e-02 : f32
    %101 = vector.broadcast %cst_36 : f32 to vector<16x128xf32>
    %102 = arith.mulf %101, %100 : vector<16x128xf32>
    %103 = arith.addf %98, %102 : vector<16x128xf32>
    %cst_37 = arith.constant 0.797884583 : f32
    %104 = vector.broadcast %cst_37 : f32 to vector<16x128xf32>
    %105 = arith.mulf %104, %103 : vector<16x128xf32>
    %106 = math.tanh %105 : vector<16x128xf32>
    %cst_38 = arith.constant 1.000000e+00 : f32
    %107 = vector.broadcast %cst_38 : f32 to vector<16x128xf32>
    %108 = arith.addf %107, %106 : vector<16x128xf32>
    %cst_39 = arith.constant 5.000000e-01 : f32
    %109 = vector.broadcast %cst_39 : f32 to vector<16x128xf32>
    %110 = arith.mulf %109, %108 : vector<16x128xf32>
    %111 = arith.mulf %98, %110 : vector<16x128xf32>
    %cst_40 = arith.constant dense<0.000000e+00> : vector<16x32xf32>
    %112 = tpu.matmul %111, %6, %cst_40 {dimension_numbers = #tpu.dot_dimension_numbers<[1], [0], [0], [1], [0, 0, 1, 1], [], []>} : vector<16x128xf32>, vector<128x32xf32>, vector<16x32xf32> -> vector<16x32xf32>
    %113 = vector.broadcast %13 : vector<1x32xf32> to vector<16x32xf32>
    %114 = arith.addf %112, %113 : vector<16x32xf32>
    %115 = arith.addf %95, %114 : vector<16x32xf32>
    %cst_41 = arith.constant dense<0.000000e+00> : vector<16xf32>
    %116 = vector.multi_reduction <add>, %115, %cst_41 [1] : vector<16x32xf32> to vector<16xf32>
    %117 = vector.shape_cast %116 : vector<16xf32> to vector<16x1xf32>
    %cst_42 = arith.constant 3.200000e+01 : f32
    %118 = vector.broadcast %cst_42 : f32 to vector<16x1xf32>
    %119 = arith.divf %117, %118 : vector<16x1xf32>
    %120 = vector.broadcast %119 : vector<16x1xf32> to vector<16x32xf32>
    %121 = arith.subf %115, %120 : vector<16x32xf32>
    %122 = arith.mulf %121, %121 : vector<16x32xf32>
    %cst_43 = arith.constant dense<0.000000e+00> : vector<16xf32>
    %123 = vector.multi_reduction <add>, %122, %cst_43 [1] : vector<16x32xf32> to vector<16xf32>
    %124 = vector.shape_cast %123 : vector<16xf32> to vector<16x1xf32>
    %cst_44 = arith.constant 3.200000e+01 : f32
    %125 = vector.broadcast %cst_44 : f32 to vector<16x1xf32>
    %126 = arith.divf %124, %125 : vector<16x1xf32>
    %127 = vector.broadcast %119 : vector<16x1xf32> to vector<16x32xf32>
    %128 = arith.subf %115, %127 : vector<16x32xf32>
    %cst_45 = arith.constant 9.99999996E-13 : f32
    %129 = vector.broadcast %cst_45 : f32 to vector<16x1xf32>
    %130 = arith.addf %126, %129 : vector<16x1xf32>
    %131 = math.rsqrt %130 : vector<16x1xf32>
    %132 = vector.broadcast %131 : vector<16x1xf32> to vector<16x32xf32>
    %133 = arith.mulf %128, %132 : vector<16x32xf32>
    %134 = vector.broadcast %14 : vector<1x32xf32> to vector<16x32xf32>
    %135 = arith.mulf %133, %134 : vector<16x32xf32>
    %136 = vector.broadcast %15 : vector<1x32xf32> to vector<16x32xf32>
    %137 = arith.addf %135, %136 : vector<16x32xf32>
    %138 = vector.shape_cast %137 : vector<16x32xf32> to vector<2x8x32xf32>
    %139 = vector.shape_cast %1 : vector<2x8xf32> to vector<2x8x1xf32>
    %140 = vector.broadcast %139 : vector<2x8x1xf32> to vector<2x8x32xf32>
    %141 = arith.mulf %138, %140 : vector<2x8x32xf32>
    %cst_46 = arith.constant dense<0.000000e+00> : vector<2x32xf32>
    %142 = vector.multi_reduction <add>, %141, %cst_46 [1] : vector<2x8x32xf32> to vector<2x32xf32>
    %cst_47 = arith.constant dense<0.000000e+00> : vector<2x1xf32>
    %143 = vector.multi_reduction <add>, %139, %cst_47 [1] : vector<2x8x1xf32> to vector<2x1xf32>
    %cst_48 = arith.constant 9.99999971E-10 : f32
    %144 = vector.broadcast %cst_48 : f32 to vector<2x1xf32>
    %145 = arith.maximumf %143, %144 : vector<2x1xf32>
    %146 = tpu.reciprocal %145 {approx = true} : vector<2x1xf32> -> vector<2x1xf32>
    %147 = vector.broadcast %146 : vector<2x1xf32> to vector<2x32xf32>
    %148 = arith.mulf %142, %147 : vector<2x32xf32>
    %cst_49 = arith.constant dense<0.000000e+00> : vector<2x128xf32>
    %149 = tpu.matmul %148, %5, %cst_49 {dimension_numbers = #tpu.dot_dimension_numbers<[1], [0], [0], [1], [0, 0, 1, 1], [], []>} : vector<2x32xf32>, vector<32x128xf32>, vector<2x128xf32> -> vector<2x128xf32>
    %150 = vector.broadcast %16 : vector<1x128xf32> to vector<2x128xf32>
    %151 = arith.addf %149, %150 : vector<2x128xf32>
    %152 = math.tanh %151 : vector<2x128xf32>
    %cst_50 = arith.constant dense<0.000000e+00> : vector<2x7xf32>
    %153 = tpu.matmul %152, %7, %cst_50 {dimension_numbers = #tpu.dot_dimension_numbers<[1], [0], [0], [1], [0, 0, 1, 1], [], []>} : vector<2x128xf32>, vector<128x7xf32>, vector<2x7xf32> -> vector<2x7xf32>
    %154 = vector.broadcast %17 : vector<1x7xf32> to vector<2x7xf32>
    %155 = arith.addf %153, %154 : vector<2x7xf32>
    %cst_51 = arith.constant 0.000000e+00 : f32
    %156 = vector.broadcast %cst_51 : f32 to vector<2x89xf32>
    %157 = tpu.concatenate %148, %155, %156 in 1 : vector<2x32xf32>, vector<2x7xf32>, vector<2x89xf32> -> vector<2x128xf32>
    %158 = vector.extract_strided_slice %62 {offsets = [0, 0, 0], sizes = [1, 8, 8], strides = [1, 1, 1]} : vector<8x8x8xf32> to vector<1x8x8xf32>
    %159 = vector.shape_cast %158 : vector<1x8x8xf32> to vector<8x8xf32>
    %160 = vector.extract_strided_slice %62 {offsets = [1, 0, 0], sizes = [1, 8, 8], strides = [1, 1, 1]} : vector<8x8x8xf32> to vector<1x8x8xf32>
    %161 = vector.shape_cast %160 : vector<1x8x8xf32> to vector<8x8xf32>
    %162 = vector.extract_strided_slice %62 {offsets = [2, 0, 0], sizes = [1, 8, 8], strides = [1, 1, 1]} : vector<8x8x8xf32> to vector<1x8x8xf32>
    %163 = vector.shape_cast %162 : vector<1x8x8xf32> to vector<8x8xf32>
    %164 = vector.extract_strided_slice %62 {offsets = [3, 0, 0], sizes = [1, 8, 8], strides = [1, 1, 1]} : vector<8x8x8xf32> to vector<1x8x8xf32>
    %165 = vector.shape_cast %164 : vector<1x8x8xf32> to vector<8x8xf32>
    %166 = vector.extract_strided_slice %62 {offsets = [4, 0, 0], sizes = [1, 8, 8], strides = [1, 1, 1]} : vector<8x8x8xf32> to vector<1x8x8xf32>
    %167 = vector.shape_cast %166 : vector<1x8x8xf32> to vector<8x8xf32>
    %168 = vector.extract_strided_slice %62 {offsets = [5, 0, 0], sizes = [1, 8, 8], strides = [1, 1, 1]} : vector<8x8x8xf32> to vector<1x8x8xf32>
    %169 = vector.shape_cast %168 : vector<1x8x8xf32> to vector<8x8xf32>
    %170 = vector.extract_strided_slice %62 {offsets = [6, 0, 0], sizes = [1, 8, 8], strides = [1, 1, 1]} : vector<8x8x8xf32> to vector<1x8x8xf32>
    %171 = vector.shape_cast %170 : vector<1x8x8xf32> to vector<8x8xf32>
    %172 = vector.extract_strided_slice %62 {offsets = [7, 0, 0], sizes = [1, 8, 8], strides = [1, 1, 1]} : vector<8x8x8xf32> to vector<1x8x8xf32>
    %173 = vector.shape_cast %172 : vector<1x8x8xf32> to vector<8x8xf32>
    %174 = tpu.concatenate %159, %161, %163, %165, %167, %169, %171, %173 in 1 : vector<8x8xf32>, vector<8x8xf32>, vector<8x8xf32>, vector<8x8xf32>, vector<8x8xf32>, vector<8x8xf32>, vector<8x8xf32>, vector<8x8xf32> -> vector<8x64xf32>
    %cst_52 = arith.constant 0.000000e+00 : f32
    %175 = vector.broadcast %cst_52 : f32 to vector<8x64xf32>
    %176 = tpu.concatenate %174, %175 in 1 : vector<8x64xf32>, vector<8x64xf32> -> vector<8x128xf32>
    %177 = tpu.concatenate %157, %176 in 0 : vector<2x128xf32>, vector<8x128xf32> -> vector<10x128xf32>
    %c0_53 = arith.constant 0 : index
    %c0_54 = arith.constant 0 : index
    %178 = vector.load %arg5[%c0_53, %c0_54] : memref<10x128xf32, #tpu.memory_space<vmem>>, vector<10x128xf32>
    tpu.vector_store %arg5[%c0_53, %c0_54], %177 {strides = array<i32>} : memref<10x128xf32, #tpu.memory_space<vmem>>, vector<10x128xf32>,
    return
  }
}

</mosaic_0001>

<bundles_post_ra>
// kernel: forward.1
= control target key start
LH: loop header
LB: loop body
LE: loop exit
PB: predicated region body
PF: predicated region fallthrough
CT: control target
= control target key end

     0   :  { %vm65_vm0 = vcmask 261120   ;;  %v2760_v11 = vmov 0.0   ;;  %s2761_s7 = smov 112   ;;  %vm2763_vm1 = vmmov 0   ;;  %s2764_s8 = smov 104   ;;  %vm188_vm2 = vcmask 64512   ;;  %s3348_s2 = inlined_call_operand.vmem [shape: f32[32,384], index: 2, kind: input, shape index: {}]   ;;  %s3349_s0 = inlined_call_operand.vmem [shape: f32[16,32], index: 0, kind: input, shape index: {}]   ;;  %s3350_s4 = inlined_call_operand.vmem [shape: f32[10,128], index: 4, kind: input, shape index: {}]   ;;  %s3351_s1 = inlined_call_operand.vmem [shape: f32[2,8], index: 1, kind: input, shape index: {}]   ;;  %s3352_s3 = inlined_call_operand.vmem [shape: f32[128,39], index: 3, kind: input, shape index: {}]   ;;  %s3353_s5 = inlined_call_operand.vmem [shape: f32[10,128], index: 5, kind: output, shape index: {}]  }
   0x1   :  { %v2809_v0 = vld [vmem:[%s3348_s2] sm:$0xff]  ;;  %v2814_v1 = vld [vmem:[%s3348_s2 + $0x18] sm:$0xff]  ;;  %v2819_v2 = vld [vmem:[%s3348_s2 + $0x30] sm:$0xff]  ;;  %2380 = vmatprep.subr.mxu1 %v2760_v11  ;;  %2382 = vmatprep.mubr.msk.f32.mxu1 %vm2763_vm1, %v2760_v11  ;;  %s2765_s9 = smov 96   ;;  %v2766_v29 = vmov 1966171168   ;;  %v167_v31 = vlaneseq }
   0x2   :  { %v2660_v3 = vpack.i.bf16 %v2814_v1, %v2809_v0  ;;  %v2558_v4 = vpack.c.bf16 %v2814_v1, %v2809_v0  ;;  %v2828_v5 = vld [vmem:[%s3348_s2 + $0x48] sm:$0xff]  ;;  %v2833_v6 = vld [vmem:[%s3349_s0] sm:$0xff]  ;;  %v165_v30 = vunpack.c.l.s4 %v2766_v29  ;;  %s2768_s12 = smov 32   ;;  %s2769_s13 = smov 8   ;;  %vm1543_vm3 = vcmask 130048  }
   0x3   :  { %v2562_v7 = vpack.c.bf16 %v2828_v5, %v2819_v2  ;;  %2372 = vmatprep.mubr.msk.f32.mxu0 %vm65_vm0, %v2833_v6  ;;  %v2842_v8 = vld [vmem:[%s3349_s0 + $0x8] sm:$0xff]  ;;  %v2232_v9 = vld [vmem:[%s3350_s4] ss:$0 sm:$0xff]  ;;  %s2762_s0 = smov 120   ;;  %v2947_v35 = vshrl.u32 %v167_v31, 7  ;;  %s2770_s14 = smov 16  }
   0x4   :  { %2559 = vmatprep.subr.bf16.mxu0 %v2558_v4  ;;  %v2944_v32 = vld [vmem:[%s3351_s1] sm:$0x3]  ;;  %v166_v34 = vunpack.c.0.s8 %v165_v30  ;;  %s2767_s1 = smov 64   ;;  %s2771_s15 = smov 24   ;;  %vm1546_vm4 = vcmask 195584   ;;  %vm2213_vm5 = vcmask 326656  }
   0x5   :  { %2561 = vmatpush3.bf16.msra.mxu0 %v2558_v4  ;;  %v2235_v33 = vadd.f32 -1.0, %v2944_v32  ;;  %v2951_v41 = vsub.s32 0, %v2947_v35  ;;  %s2772_s25 = smov 40   ;;  %s2774_s26 = smov 56   ;;  %vm2215_vm6 = vcmask 392192   ;;  %vm2217_vm7 = vcmask 457728  }
   0x6   :  { %2563 = vmatprep.subr.bf16.mxu0 %v2562_v7  ;;  %v169_v37 = vsub.s32 %v166_v34, %v2947_v35  ;;  %s2775_s27 = smov 48   ;;  %vm2219_vm8 = vcmask 523264   ;;  %vm1967_vm9 = vcmask 1041409   ;;  %vm2186_vm10 = vcmask 318464  }
   0x7   :  { %v162_v36 = vmul.f32 1e+09, %v2235_v33  ;;  %vm2224_vm11 = vcmask 1041408  }
   0x9   :  { %2565 = vmatpush3.bf16.msra.mxu0 %v2562_v7  ;;  %v170_v38 = vrot.slane %v162_v36, %v169_v37 }
   0xa   :  { %2375 = vmatprep.subr.mxu0 %v2760_v11 }
   0xb   :  { %v171_v39 = vcombine.high %v170_v38, %v170_v38  ;;  %v178_v42 = vrot.slane %v170_v38, %v169_v37 }
   0xc   :  { %2373 = vmatmul.mubr.msk.f32.vlgmr.msra.gmra.mrb[0].mxu0 %vm65_vm0, %v2842_v8 }
   0xd   :  { %2377 = vmatprep.mubr.msk.f32.mxu0 %vm2763_vm1, %v2760_v11  ;;  %v185_v40 = vrot.slane %v171_v39, %v169_v37  ;;  %v806_v45 = vrot.slane %v178_v42, %v2951_v41 }
   0xf   :  { %v810_v43 = vrot.slane %v185_v40, %v2951_v41 }
  0xdf   :  { %v2374_v10 = vpop.f32.mrb[0].mxu0 }
  0xe0   :  { %v138_v12 = vpop.f32.mrb[1].mxu0  ;;  %v2859_v14 = vadd.f32 %v2374_v10, %v2232_v9 }
  0xe1   :  { %v2851_v13 = vadd.f32 %v2232_v9, %v138_v12 }
  0xe3   :  { %153 = vrot.lane.b32.xlu1 %v2851_v13, %s2761_s7  ;;  %149 = vrot.lane.b32.xlu0 %v2851_v13, %s2762_s0 }
  0xe7   :  { %155 = vrot.lane.b32.xlu1 %v2859_v14, %s2761_s7  ;;  %151 = vrot.lane.b32.xlu0 %v2859_v14, %s2762_s0 }
  0xeb   :  { %159 = vrot.lane.b32.xlu1 %v2859_v14, %s2764_s8  ;;  %157 = vrot.lane.b32.xlu0 %v2851_v13, %s2764_s8 }
  0xef   :  { %263 = vrot.lane.b32.xlu1 %v2859_v14, %s2765_s9  ;;  %186 = vrot.lane.b32.xlu0 %v2851_v13, %s2765_s9 }
 0x155   :  { %v2869_v15 = vpop.permute.xlu1 %153  ;;  %v2871_v16 = vpop.permute.xlu0 %149 }
 0x156   :  { %339 = vrot.lane.b32.xlu0 %v2871_v16, %s2765_s9 }
 0x159   :  { %v2875_v17 = vpop.permute.xlu1 %155  ;;  %v2877_v18 = vpop.permute.xlu0 %151 }
 0x15a   :  { %491 = vrot.lane.b32.xlu0 %v2869_v15, %s2765_s9  ;;  %415 = vrot.lane.b32.xlu1 %v2877_v18, %s2765_s9 }
 0x15d   :  { %v2883_v19 = vpop.permute.xlu1 %159  ;;  %v2885_v20 = vpop.permute.xlu0 %157 }
 0x15e   :  { %567 = vrot.lane.b32.xlu1 %v2875_v17, %s2765_s9  ;;  %643 = vrot.lane.b32.xlu0 %v2885_v20, %s2765_s9 }
 0x161   :  { %v264_v21 = vpop.permute.xlu1 %263  ;;  %v187_v22 = vpop.permute.xlu0 %186 }
 0x162   :  { %2381 = vmatpush3.xpose.msk.msra.mxu1 %vm188_vm2, %v264_v21  ;;  %719 = vrot.lane.b32.xlu1 %v2883_v19, %s2765_s9 }
 0x163   :  { %2376 = vmatpush3.xpose.msk.msra.mxu0 %vm188_vm2, %v187_v22  ;;  %2390 = vmatprep.subr.mxu1 %v2760_v11 }
 0x164   :  { %2385 = vmatprep.subr.mxu0 %v2760_v11 }
 0x165   :  { %2383 = vmatmul.mubr.msk.f32.vlgmr.msra.gmra.mrb[0].mxu1 %vm188_vm2, %v2859_v14 }
 0x166   :  { %2378 = vmatmul.mubr.msk.f32.vlgmr.msra.gmra.mrb[2].mxu0 %vm188_vm2, %v2851_v13  ;;  %2392 = vmatprep.mubr.msk.f32.mxu1 %vm2763_vm1, %v2760_v11 }
 0x167   :  { %2387 = vmatprep.mubr.msk.f32.mxu0 %vm2763_vm1, %v2760_v11 }
 0x1c8   :  { %v340_v23 = vpop.permute.xlu0 %339 }
 0x1c9   :  { %2386 = vmatpush3.xpose.msk.msra.mxu0 %vm188_vm2, %v340_v23 }
 0x1ca   :  { %2395 = vmatprep.subr.mxu0 %v2760_v11 }
 0x1cc   :  { %v416_v24 = vpop.permute.xlu1 %415  ;;  %2388 = vmatmul.mubr.msk.f32.vlgmr.msra.gmra.mrb[4].mxu0 %vm188_vm2, %v2871_v16  ;;  %v492_v25 = vpop.permute.xlu0 %491 }
 0x1cd   :  { %2391 = vmatpush3.xpose.msk.msra.mxu1 %vm188_vm2, %v416_v24  ;;  %2396 = vmatpush3.xpose.msk.msra.mxu0 %vm188_vm2, %v492_v25 }
 0x1ce   :  { %2397 = vmatprep.mubr.msk.f32.mxu0 %vm2763_vm1, %v2760_v11  ;;  %2400 = vmatprep.subr.mxu1 %v2760_v11 }
 0x1cf   :  { %2405 = vmatprep.subr.mxu0 %v2760_v11 }
 0x1d0   :  { %2393 = vmatmul.mubr.msk.f32.vlgmr.msra.gmra.mrb[2].mxu1 %vm188_vm2, %v2877_v18  ;;  %v568_v26 = vpop.permute.xlu1 %567  ;;  %2398 = vmatmul.mubr.msk.f32.vlgmr.msra.gmra.mrb[6].mxu0 %vm188_vm2, %v2869_v15  ;;  %v644_v27 = vpop.permute.xlu0 %643 }
 0x1d1   :  { %2401 = vmatpush3.xpose.msk.msra.mxu1 %vm188_vm2, %v568_v26  ;;  %2406 = vmatpush3.xpose.msk.msra.mxu0 %vm188_vm2, %v644_v27 }
 0x1d2   :  { %2402 = vmatprep.mubr.msk.f32.mxu1 %vm2763_vm1, %v2760_v11  ;;  %2407 = vmatprep.mubr.msk.f32.mxu0 %vm2763_vm1, %v2760_v11 }
 0x1d3   :  { %2410 = vmatprep.subr.mxu1 %v2760_v11  ;;  %2415 = vmatprep.subr.mxu0 %v2760_v11 }
 0x1d4   :  { %2403 = vmatmul.mubr.msk.f32.vlgmr.msra.gmra.mrb[4].mxu1 %vm188_vm2, %v2875_v17  ;;  %v720_v28 = vpop.permute.xlu1 %719  ;;  %2408 = vmatmul.mubr.msk.f32.vlgmr.msra.gmra.mrb[8].mxu0 %vm188_vm2, %v2885_v20 }
 0x1d5   :  { %2411 = vmatpush3.xpose.msk.msra.mxu1 %vm188_vm2, %v720_v28  ;;  %2412 = vmatprep.mubr.msk.f32.mxu1 %vm2763_vm1, %v2760_v11 }
 0x1d6   :  { %2420 = vmatprep.subr.mxu1 %v2760_v11  ;;  %2417 = vmatprep.mubr.msk.f32.mxu0 %vm2763_vm1, %v2760_v11 }
 0x1d8   :  { %2413 = vmatmul.mubr.msk.f32.vlgmr.msra.gmra.mrb[6].mxu1 %vm188_vm2, %v2883_v19 }
 0x1d9   :  { %2422 = vmatprep.mubr.msk.f32.mxu1 %vm2763_vm1, %v2760_v11 }
 0x238   :  { %v335_v44 = vpop.f32.mrb[0].mxu1 }
 0x239   :  { %v259_v46 = vpop.f32.mrb[2].mxu0  ;;  %v796_v47 = vmul.f32 0.35355338, %v335_v44  ;;  %v2384_v48 = vpop.f32.mrb[1].mxu1 }
 0x23a   :  { %v795_v49 = vmul.f32 0.35355338, %v259_v46  ;;  %v2379_v50 = vpop.f32.mrb[3].mxu0 }
 0x23b   :  { %v814_v51 = vadd.f32 %v810_v43, %v796_v47 }
 0x23c   :  { %v813_v52 = vadd.f32 %v806_v45, %v795_v49 }
 0x23d   :  { %v824_v53 = vsel %vm188_vm2, %v814_v51, -inf }
 0x23e   :  { %825 = vmax.xlane.f32.xlu1 %v824_v53  ;;  %v821_v54 = vsel %vm188_vm2, %v813_v52, -inf }
 0x23f   :  { %822 = vmax.xlane.f32.xlu0 %v821_v54 }
 0x29f   :  { %v411_v55 = vpop.f32.mrb[4].mxu0 }
 0x2a0   :  { %v797_v56 = vmul.f32 0.35355338, %v411_v55  ;;  %v2389_v57 = vpop.f32.mrb[5].mxu0 }
 0x2a2   :  { %v815_v58 = vadd.f32 %v806_v45, %v797_v56 }
 0x2a3   :  { %v487_v59 = vpop.f32.mrb[2].mxu1  ;;  %v563_v60 = vpop.f32.mrb[6].mxu0 }
 0x2a4   :  { %v798_v61 = vmul.f32 0.35355338, %v487_v59  ;;  %v799_v62 = vmul.f32 0.35355338, %v563_v60  ;;  %v2394_v63 = vpop.f32.mrb[3].mxu1  ;;  %v2399_v4 = vpop.f32.mrb[7].mxu0 }
 0x2a5   :  { %v827_v7 = vsel %vm188_vm2, %v815_v58, -inf }
 0x2a6   :  { %828 = vmax.xlane.f32.xlu0 %v827_v7  ;;  %v816_v9 = vadd.f32 %v810_v43, %v798_v61  ;;  %v817_v10 = vadd.f32 %v806_v45, %v799_v62 }
 0x2a7   :  { %v639_v12 = vpop.f32.mrb[4].mxu1  ;;  %v715_v21 = vpop.f32.mrb[8].mxu0 }
 0x2a8   :  { %v800_v22 = vmul.f32 0.35355338, %v639_v12  ;;  %v801_v23 = vmul.f32 0.35355338, %v715_v21  ;;  %v2404_v24 = vpop.f32.mrb[5].mxu1  ;;  %v2409_v25 = vpop.f32.mrb[9].mxu0 }
 0x2a9   :  { %v830_v26 = vsel %vm188_vm2, %v816_v9, -inf  ;;  %v833_v27 = vsel %vm188_vm2, %v817_v10, -inf }
 0x2aa   :  { %831 = vmax.xlane.f32.xlu0 %v830_v26  ;;  %834 = vmax.xlane.f32.xlu1 %v833_v27  ;;  %v818_v28 = vadd.f32 %v810_v43, %v800_v22  ;;  %v819_v29 = vadd.f32 %v806_v45, %v801_v23 }
 0x2ab   :  { %v791_v30 = vpop.f32.mrb[6].mxu1 }
 0x2ac   :  { %v802_v31 = vmul.f32 0.35355338, %v791_v30  ;;  %v2414_v33 = vpop.f32.mrb[7].mxu1  ;;  %v836_v34 = vsel %vm188_vm2, %v818_v28, -inf  ;;  %v839_v36 = vsel %vm188_vm2, %v819_v29, -inf }
 0x2ae   :  { %837 = vmax.xlane.f32.xlu0 %v836_v34  ;;  %840 = vmax.xlane.f32.xlu1 %v839_v36  ;;  %v820_v37 = vadd.f32 %v810_v43, %v802_v31 }
 0x2b0   :  { %v842_v38 = vsel %vm188_vm2, %v820_v37, -inf }
 0x2b2   :  { %843 = vmax.xlane.f32.xlu0 %v842_v38 }
 0x2bf   :  { %909 = vrot.lane.b32.xlu1 %v2851_v13, %s2767_s1 }
 0x2c3   :  { %1061 = vrot.lane.b32.xlu1 %v2871_v16, %s2767_s1 }
 0x2c7   :  { %1137 = vrot.lane.b32.xlu1 %v2877_v18, %s2767_s1 }
 0x2c8   :  { %985 = vrot.lane.b32.xlu0 %v2859_v14, %s2767_s1 }
 0x2cb   :  { %1289 = vrot.lane.b32.xlu1 %v2875_v17, %s2767_s1  ;;  %v826_v39 = vpop.xlane.xlu1 %825 }
 0x2cc   :  { %1213 = vrot.lane.b32.xlu0 %v2869_v15, %s2767_s1  ;;  %v846_v40 = vsub.f32 %v814_v51, %v826_v39  ;;  %v823_v42 = vpop.xlane.xlu0 %822 }
 0x2cd   :  { %v845_v13 = vsub.f32 %v813_v52, %v823_v42 }
 0x2ce   :  { %v855_v43 = vmul.f32 1.442695, %v846_v40 }
 0x2cf   :  { %v853_v44 = vmul.f32 1.442695, %v845_v13 }
 0x2d0   :  { %2710 = vpow2.f32 %v855_v43 }
 0x2d1   :  { %2712 = vpow2.f32 %v853_v44 }
 0x2da   :  { %v2975_v16 = vpop.eup %2710 }
 0x2db   :  { %v872_v18 = vsel %vm188_vm2, %v2975_v16, 0.0  ;;  %v2979_v14 = vpop.eup %2712 }
 0x2dc   :  { %v869_v17 = vsel %vm188_vm2, %v2979_v14, 0.0 }
 0x2eb   :  { %873 = vadd.xlane.f32.xlu0 %v872_v18 }
 0x2ef   :  { %870 = vadd.xlane.f32.xlu1 %v869_v17 }
 0x333   :  { %v829_v15 = vpop.xlane.xlu0 %828 }
 0x334   :  { %v847_v45 = vsub.f32 %v815_v58, %v829_v15 }
 0x336   :  { %v857_v46 = vmul.f32 1.442695, %v847_v45 }
 0x337   :  { %v835_v47 = vpop.xlane.xlu1 %834  ;;  %v832_v48 = vpop.xlane.xlu0 %831 }
 0x338   :  { %2714 = vpow2.f32 %v857_v46  ;;  %v849_v49 = vsub.f32 %v817_v10, %v835_v47  ;;  %v848_v50 = vsub.f32 %v816_v9, %v832_v48 }
 0x33a   :  { %v861_v51 = vmul.f32 1.442695, %v849_v49  ;;  %v859_v52 = vmul.f32 1.442695, %v848_v50  ;;  %v2665_v50 = vpack.i.bf16 %v2828_v5, %v2819_v2 }
 0x33b   :  { %v841_v53 = vpop.xlane.xlu1 %840  ;;  %v838_v54 = vpop.xlane.xlu0 %837 }
 0x33c   :  { %2716 = vpow2.f32 %v861_v51  ;;  %v851_v55 = vsub.f32 %v819_v29, %v841_v53  ;;  %v850_v56 = vsub.f32 %v818_v28, %v838_v54 }
 0x33d   :  { %2718 = vpow2.f32 %v859_v52 }
 0x33e   :  { %v865_v57 = vmul.f32 1.442695, %v851_v55  ;;  %v863_v59 = vmul.f32 1.442695, %v850_v56 }
 0x33f   :  { %v910_v60 = vpop.permute.xlu1 %909  ;;  %v844_v61 = vpop.xlane.xlu0 %843 }
 0x340   :  { %2720 = vpow2.f32 %v865_v57  ;;  %v852_v58 = vsub.f32 %v820_v37, %v844_v61  ;;  %2416 = vmatpush3.msra.mxu0 %v910_v60 }
 0x341   :  { %2722 = vpow2.f32 %v863_v59  ;;  %2425 = vmatprep.subr.mxu0 %v2760_v11 }
 0x342   :  { %v2715_v62 = vpop.eup %2714  ;;  %v867_v63 = vmul.f32 1.442695, %v852_v58 }
 0x343   :  { %v986_v4 = vpop.permute.xlu0 %985  ;;  %v875_v7 = vsel %vm188_vm2, %v2715_v62, 0.0  ;;  %v1062_v28 = vpop.permute.xlu1 %1061 }
 0x344   :  { %2724 = vpow2.f32 %v867_v63  ;;  %876 = vadd.xlane.f32.xlu1 %v875_v7  ;;  %2421 = vmatpush3.msra.mxu1 %v986_v4 }
 0x345   :  { %2430 = vmatprep.subr.mxu1 %v2760_v11 }
 0x346   :  { %v2717_v9 = vpop.eup %2716 }
 0x347   :  { %v2719_v10 = vpop.eup %2718  ;;  %v881_v12 = vsel %vm188_vm2, %v2717_v9, 0.0  ;;  %v1138_v29 = vpop.permute.xlu1 %1137 }
 0x348   :  { %882 = vadd.xlane.f32.xlu1 %v881_v12  ;;  %v878_v21 = vsel %vm188_vm2, %v2719_v10, 0.0  ;;  %v1214_v30 = vpop.permute.xlu0 %1213 }
 0x349   :  { %879 = vadd.xlane.f32.xlu0 %v878_v21 }
 0x34a   :  { %v2721_v22 = vpop.eup %2720 }
 0x34b   :  { %v2988_v23 = vpop.eup %2722  ;;  %v887_v24 = vsel %vm188_vm2, %v2721_v22, 0.0  ;;  %v1290_v31 = vpop.permute.xlu1 %1289 }
 0x34c   :  { %888 = vadd.xlane.f32.xlu1 %v887_v24  ;;  %v884_v25 = vsel %vm188_vm2, %v2988_v23, 0.0 }
 0x34d   :  { %885 = vadd.xlane.f32.xlu0 %v884_v25 }
 0x34e   :  { %v2993_v26 = vpop.eup %2724 }
 0x34f   :  { %v890_v27 = vsel %vm188_vm2, %v2993_v26, 0.0 }
 0x351   :  { %891 = vadd.xlane.f32.xlu0 %v890_v27 }
 0x35d   :  { %1441 = vrot.lane.b32.xlu1 %v2883_v19, %s2767_s1 }
 0x361   :  { %2666 = vrot.lane.b32.xlu1 %v2665_v50, %s2768_s12 }
 0x367   :  { %1365 = vrot.lane.b32.xlu0 %v2885_v20, %s2767_s1 }
 0x36b   :  { %2661 = vrot.lane.b32.xlu0 %v2660_v3, %s2768_s12 }
 0x378   :  { %v874_v33 = vpop.xlane.xlu0 %873 }
 0x379   :  { %2726 = vrcp.f32 %v874_v33 }
 0x37c   :  { %v871_v34 = vpop.xlane.xlu1 %870 }
 0x37d   :  { %2728 = vrcp.f32 %v871_v34 }
 0x383   :  { %v2727_v36 = vpop.eup %2726 }
 0x384   :  { %v3002_v37 = vmul.f32 %v2727_v36, %v2975_v16 }
 0x386   :  { %2423 = vmatmul.mubr.msk.f32.vlgmr.msra.gmra.mrb[8].mxu1 %vm188_vm2, %v3002_v37 }
 0x387   :  { %v2729_v38 = vpop.eup %2728  ;;  %2431 = vmatpush3.msra.mxu1 %v1138_v29  ;;  %2432 = vmatprep.mubr.msk.f32.mxu1 %vm2763_vm1, %v2760_v11 }
 0x388   :  { %v3009_v19 = vmul.f32 %v2729_v38, %v2979_v14  ;;  %2440 = vmatprep.subr.mxu1 %v2760_v11 }
 0x38a   :  { %2418 = vmatmul.mubr.msk.f32.vlgmr.msra.gmra.mrb[10].mxu0 %vm188_vm2, %v3009_v19 }
 0x38b   :  { %2426 = vmatpush3.msra.mxu0 %v1062_v28  ;;  %2427 = vmatprep.mubr.msk.f32.mxu0 %vm2763_vm1, %v2760_v11 }
 0x38c   :  { %2435 = vmatprep.subr.mxu0 %v2760_v11 }
 0x3d1   :  { %v877_v20 = vpop.xlane.xlu1 %876 }
 0x3d2   :  { %2730 = vrcp.f32 %v877_v20 }
 0x3d5   :  { %v883_v39 = vpop.xlane.xlu1 %882 }
 0x3d6   :  { %2732 = vrcp.f32 %v883_v39  ;;  %v880_v40 = vpop.xlane.xlu0 %879  ;;  %v2260_v39 = vld [vmem:[%s3350_s4 + $0x1] ss:$0 sm:$0xff] }
 0x3d7   :  { %2734 = vrcp.f32 %v880_v40 }
 0x3d9   :  { %v889_v42 = vpop.xlane.xlu1 %888 }
 0x3da   :  { %2736 = vrcp.f32 %v889_v42  ;;  %v886_v43 = vpop.xlane.xlu0 %885 }
 0x3db   :  { %2738 = vrcp.f32 %v886_v43 }
 0x3dc   :  { %v2731_v13 = vpop.eup %2730 }
 0x3dd   :  { %v3017_v44 = vmul.f32 %v2731_v13, %v2715_v62  ;;  %v1442_v47 = vpop.permute.xlu1 %1441 }
 0x3de   :  { %v892_v16 = vpop.xlane.xlu0 %891 }
 0x3df   :  { %2740 = vrcp.f32 %v892_v16  ;;  %2428 = vmatmul.mubr.msk.f32.vlgmr.msra.gmra.mrb[12].mxu0 %vm188_vm2, %v3017_v44 }
 0x3e0   :  { %v2733_v18 = vpop.eup %2732  ;;  %2436 = vmatpush3.msra.mxu0 %v1214_v30  ;;  %2437 = vmatprep.mubr.msk.f32.mxu0 %vm2763_vm1, %v2760_v11 }
 0x3e1   :  { %v2735_v14 = vpop.eup %2734  ;;  %v3027_v17 = vmul.f32 %v2733_v18, %v2717_v9  ;;  %2445 = vmatprep.subr.mxu0 %v2760_v11  ;;  %v2667_v60 = vpop.permute.xlu1 %2666 }
 0x3e2   :  { %v3030_v15 = vmul.f32 %v2735_v14, %v2719_v10  ;;  %v1366_v45 = vpop.permute.xlu0 %1365  ;;  %v2669_v61 = vunpack.i.h.bf16 %v2667_v60  ;;  %v2668_v58 = vunpack.i.l.bf16 %v2667_v60 }
 0x3e3   :  { %2438 = vmatmul.mubr.msk.f32.vlgmr.msra.gmra.mrb[14].mxu0 %vm188_vm2, %v3027_v17 }
 0x3e4   :  { %v2737_v46 = vpop.eup %2736  ;;  %2433 = vmatmul.mubr.msk.f32.vlgmr.msra.gmra.mrb[10].mxu1 %vm188_vm2, %v3030_v15  ;;  %2446 = vmatpush3.msra.mxu0 %v1366_v45  ;;  %v2570_v62 = vpack.c.bf16 %v2669_v61, %v2668_v58 }
 0x3e5   :  { %v2739_v0 = vpop.eup %2738  ;;  %v3036_v1 = vmul.f32 %v2737_v46, %v2721_v22  ;;  %2441 = vmatpush3.msra.mxu1 %v1290_v31  ;;  %2442 = vmatprep.mubr.msk.f32.mxu1 %vm2763_vm1, %v2760_v11 }
 0x3e6   :  { %v3041_v3 = vmul.f32 %v2739_v0, %v2988_v23  ;;  %2447 = vmatprep.mubr.msk.f32.mxu0 %vm2763_vm1, %v2760_v11  ;;  %2450 = vmatprep.subr.mxu1 %v2760_v11  ;;  %v2662_v51 = vpop.permute.xlu0 %2661 }
 0x3e7   :  { %2448 = vmatmul.mubr.msk.f32.vlgmr.msra.gmra.mrb[16].mxu0 %vm188_vm2, %v3036_v1  ;;  %v2664_v52 = vunpack.i.h.bf16 %v2662_v51  ;;  %v2663_v53 = vunpack.i.l.bf16 %v2662_v51 }
 0x3e8   :  { %2443 = vmatmul.mubr.msk.f32.vlgmr.msra.gmra.mrb[12].mxu1 %vm188_vm2, %v3041_v3 }
 0x3e9   :  { %v2741_v48 = vpop.eup %2740  ;;  %2451 = vmatpush3.msra.mxu1 %v1442_v47  ;;  %2452 = vmatprep.mubr.msk.f32.mxu1 %vm2763_vm1, %v2760_v11  ;;  %v2566_v54 = vpack.c.bf16 %v2664_v52, %v2663_v53 }
 0x3ea   :  { %v3053_v49 = vmul.f32 %v2741_v48, %v2993_v26 }
 0x3eb   :  { %2567 = vmatprep.subr.bf16.mxu0 %v2566_v54 }
 0x3ec   :  { %2453 = vmatmul.mubr.msk.f32.vlgmr.msra.gmra.mrb[14].mxu1 %vm188_vm2, %v3053_v49  ;;  %2569 = vmatpush3.bf16.msra.mxu0 %v2566_v54 }
 0x3ed   :  { %2571 = vmatprep.subr.bf16.mxu0 %v2570_v62 }
 0x3f0   :  { %2573 = vmatpush3.bf16.msra.mxu0 %v2570_v62 }
 0x459   :  { %v1057_v55 = vpop.f32.mrb[8].mxu1 }
 0x45a   :  { %v2424_v56 = vpop.f32.mrb[9].mxu1 }
 0x45d   :  { %v981_v57 = vpop.f32.mrb[10].mxu0 }
 0x45e   :  { %v2419_v59 = vpop.f32.mrb[11].mxu0 }
 0x45f   :  { %v30_v59 = vld [vmem:[%s3348_s2 + $0x50] sm:$0xff] }
 0x4b2   :  { %v1133_v63 = vpop.f32.mrb[12].mxu0 }
 0x4b3   :  { %v2429_v2 = vpop.f32.mrb[13].mxu0  ;;  %1519 = vrot.lane.b32.xlu0 %v1133_v63, %s2769_s13 }
 0x4b6   :  { %v1285_v5 = vpop.f32.mrb[14].mxu0 }
 0x4b7   :  { %v1209_v4 = vpop.f32.mrb[10].mxu1  ;;  %1527 = vrot.lane.b32.xlu0 %v1285_v5, %s2770_s14  ;;  %v2439_v7 = vpop.f32.mrb[15].mxu0 }
 0x4b8   :  { %1521 = vrot.lane.b32.xlu1 %v1209_v4, %s2769_s13  ;;  %v2434_v9 = vpop.f32.mrb[11].mxu1  ;;  %v2263_v7 = vld [vmem:[%s3350_s4 + $0x2] ss:$0 sm:$0xff] }
 0x4ba   :  { %v1437_v10 = vpop.f32.mrb[16].mxu0 }
 0x4bb   :  { %v1361_v12 = vpop.f32.mrb[12].mxu1  ;;  %1535 = vrot.lane.b32.xlu0 %v1437_v10, %s2771_s15  ;;  %v2449_v21 = vpop.f32.mrb[17].mxu0  ;;  %v2264_v10 = vld [vmem:[%s3350_s4 + $0x3] ss:$0 sm:$0xff] }
 0x4bc   :  { %1529 = vrot.lane.b32.xlu1 %v1361_v12, %s2770_s14  ;;  %v2444_v22 = vpop.f32.mrb[13].mxu1 }
 0x4bf   :  { %v1513_v23 = vpop.f32.mrb[14].mxu1 }
 0x4c0   :  { %1537 = vrot.lane.b32.xlu1 %v1513_v23, %s2771_s15  ;;  %v2454_v24 = vpop.f32.mrb[15].mxu1 }
 0x525   :  { %v1520_v25 = vpop.permute.xlu0 %1519 }
 0x526   :  { %v1541_v28 = vsel %vm188_vm2, %v981_v57, %v1520_v25  ;;  %v29_v57 = vld [vmem:[%s3348_s2 + $0x38] sm:$0xff] }
 0x527   :  { %v2578_v60 = vpack.c.bf16 %v30_v59, %v29_v57 }
 0x529   :  { %v1528_v26 = vpop.permute.xlu0 %1527 }
 0x52a   :  { %v1522_v27 = vpop.permute.xlu1 %1521  ;;  %v1544_v29 = vsel %vm1543_vm3, %v1541_v28, %v1528_v26  ;;  %v3114_v26 = vld [vmem:[%s3352_s3] sm:$0xff] }
 0x52b   :  { %v1542_v34 = vsel %vm188_vm2, %v1057_v55, %v1522_v27  ;;  %v28_v55 = vld [vmem:[%s3348_s2 + $0x20] sm:$0xff]  ;;  %v3119_v27 = vld [vmem:[%s3352_s3 + $0x8] sm:$0xff] }
 0x52c   :  { %v2582_v28 = vpack.c.bf16 %v3119_v27, %v3114_v26 }
 0x52d   :  { %v1536_v30 = vpop.permute.xlu0 %1535 }
 0x52e   :  { %v1530_v31 = vpop.permute.xlu1 %1529  ;;  %v1547_v33 = vsel %vm1546_vm4, %v1544_v29, %v1536_v30  ;;  %2583 = vmatprep.subr.bf16.mxu0 %v2582_v28  ;;  %v3126_v29 = vld [vmem:[%s3352_s3 + $0x10] sm:$0xff]  ;;  %v3131_v30 = vld [vmem:[%s3352_s3 + $0x18] sm:$0xff] }
 0x52f   :  { %2463 = vmatprep.mubr.msk.f32.mxu0 %vm65_vm0, %v1547_v33  ;;  %v1545_v36 = vsel %vm1543_vm3, %v1542_v34, %v1530_v31  ;;  %v2586_v31 = vpack.c.bf16 %v3131_v30, %v3126_v29  ;;  %v3138_v33 = vld [vmem:[%s3352_s3 + $0x20] sm:$0xff]  ;;  %v3143_v34 = vld [vmem:[%s3352_s3 + $0x28] sm:$0xff] }
 0x532   :  { %v1538_v38 = vpop.permute.xlu1 %1537 }
 0x533   :  { %v1548_v20 = vsel %vm1546_vm4, %v1545_v36, %v1538_v38  ;;  %v2590_v36 = vpack.c.bf16 %v3143_v34, %v3138_v33  ;;  %v3150_v38 = vld [vmem:[%s3352_s3 + $0x30] sm:$0xff] }
 0x534   :  { %2464 = vmatmul.mubr.msk.f32.vlgmr.msra.gmra.mrb[18].mxu0 %vm65_vm0, %v1548_v20  ;;  %v3155_v20 = vld [vmem:[%s3352_s3 + $0x38] sm:$0xff] }
 0x535   :  { %2585 = vmatpush3.bf16.msra.mxu0 %v2582_v28 }
 0x536   :  { %2587 = vmatprep.subr.bf16.mxu0 %v2586_v31 }
 0x539   :  { %2589 = vmatpush3.bf16.msra.mxu0 %v2586_v31 }
 0x53a   :  { %2591 = vmatprep.subr.bf16.mxu0 %v2590_v36 }
 0x53d   :  { %2593 = vmatpush3.bf16.msra.mxu0 %v2590_v36 }
 0x607   :  { %v2465_v40 = vpop.f32.mrb[18].mxu0 }
 0x608   :  { %v1647_v42 = vadd.f32 %v2465_v40, %v2260_v39  ;;  %v1641_v43 = vpop.f32.mrb[19].mxu0  ;;  %v3162_v40 = vld [vmem:[%s3352_s3 + $0x40] sm:$0xff] }
 0x609   :  { %v1642_v13 = vadd.f32 %v2260_v39, %v1641_v43  ;;  %v2594_v39 = vpack.c.bf16 %v3155_v20, %v3150_v38  ;;  %v3172_v43 = vld [vmem:[%s3352_s3 + $0x50] sm:$0xff] }
 0x60a   :  { %v1651_v16 = vadd.f32 %v1647_v42, %v2842_v8  ;;  %v3167_v42 = vld [vmem:[%s3352_s3 + $0x48] sm:$0xff] }
 0x60b   :  { %v1650_v18 = vadd.f32 %v1642_v13, %v2833_v6  ;;  %v27_v6 = vld [vmem:[%s3348_s2 + $0x8] sm:$0xff]  ;;  %2595 = vmatprep.subr.bf16.mxu0 %v2594_v39  ;;  %v2598_v13 = vpack.c.bf16 %v3167_v42, %v3162_v40 }
 0x60c   :  { %v1655_v14 = vsel %vm65_vm0, %v1651_v16, 0.0  ;;  %v2574_v56 = vpack.c.bf16 %v28_v55, %v27_v6  ;;  %2597 = vmatpush3.bf16.msra.mxu0 %v2594_v39 }
 0x60d   :  { %1656 = vadd.xlane.f32.xlu1 %v1655_v14  ;;  %v1652_v45 = vsel %vm65_vm0, %v1650_v18, 0.0  ;;  %2599 = vmatprep.subr.bf16.mxu0 %v2598_v13  ;;  %v3186_v14 = vld [vmem:[%s3352_s3 + $0x60] sm:$0xff] }
 0x60e   :  { %1653 = vadd.xlane.f32.xlu0 %v1652_v45  ;;  %2575 = vmatprep.subr.bf16.mxu1 %v2574_v56  ;;  %v3191_v45 = vld [vmem:[%s3352_s3 + $0x68] sm:$0xff] }
 0x60f   :  { %2577 = vmatpush3.bf16.msra.mxu1 %v2574_v56 }
 0x610   :  { %2579 = vmatprep.subr.bf16.mxu1 %v2578_v60  ;;  %2601 = vmatpush3.bf16.msra.mxu0 %v2598_v13 }
 0x613   :  { %2581 = vmatpush3.bf16.msra.mxu1 %v2578_v60 }
 0x69a   :  { %v1657_v46 = vpop.xlane.xlu1 %1656 }
 0x69b   :  { %v1660_v0 = vmul.f32 0.03125, %v1657_v46  ;;  %v1654_v47 = vpop.xlane.xlu0 %1653  ;;  %v2606_v46 = vpack.c.bf16 %v3191_v45, %v3186_v14 }
 0x69c   :  { %v1659_v48 = vmul.f32 0.03125, %v1654_v47  ;;  %v3203_v47 = vld [vmem:[%s3352_s3 + $0x78] sm:$0xff] }
 0x69d   :  { %v1662_v50 = vsub.f32 %v1651_v16, %v1660_v0  ;;  %v3179_v16 = vld [vmem:[%s3352_s3 + $0x58] sm:$0xff]  ;;  %v3198_v0 = vld [vmem:[%s3352_s3 + $0x70] sm:$0xff] }
 0x69e   :  { %v1661_v51 = vsub.f32 %v1650_v18, %v1659_v48  ;;  %v2602_v18 = vpack.c.bf16 %v3179_v16, %v3172_v43  ;;  %v2610_v48 = vpack.c.bf16 %v3203_v47, %v3198_v0 }
 0x69f   :  { %v1664_v54 = vmul.f32 %v1662_v50, %v1662_v50 }
 0x6a0   :  { %v1663_v52 = vmul.f32 %v1661_v51, %v1661_v51  ;;  %2603 = vmatprep.subr.bf16.mxu0 %v2602_v18 }
 0x6a1   :  { %v1668_v8 = vsel %vm65_vm0, %v1664_v54, 0.0  ;;  %2605 = vmatpush3.bf16.msra.mxu0 %v2602_v18 }
 0x6a2   :  { %v1665_v53 = vsel %vm65_vm0, %v1663_v52, 0.0  ;;  %2607 = vmatprep.subr.bf16.mxu0 %v2606_v46 }
 0x6a3   :  { %1666 = vadd.xlane.f32.xlu0 %v1665_v53 }
 0x6a5   :  { %2609 = vmatpush3.bf16.msra.mxu0 %v2606_v46 }
 0x6a6   :  { %2611 = vmatprep.subr.bf16.mxu0 %v2610_v48 }
 0x6a7   :  { %1669 = vadd.xlane.f32.xlu0 %v1668_v8 }
 0x6a9   :  { %2613 = vmatpush3.bf16.msra.mxu0 %v2610_v48 }
 0x730   :  { %v1667_v61 = vpop.xlane.xlu0 %1666 }
 0x731   :  { %v1671_v58 = vmul.f32 0.03125, %v1667_v61 }
 0x733   :  { %v1673_v62 = vadd.f32 1e-12, %v1671_v58 }
 0x734   :  { %v1670_v63 = vpop.xlane.xlu0 %1669 }
 0x735   :  { %2742 = vrsqrt.f32 %v1673_v62  ;;  %v1672_v2 = vmul.f32 0.03125, %v1670_v63 }
 0x737   :  { %v1674_v5 = vadd.f32 1e-12, %v1672_v2 }
 0x739   :  { %2744 = vrsqrt.f32 %v1674_v5 }
 0x73f   :  { %v2743_v4 = vpop.eup %2742 }
 0x740   :  { %v1677_v9 = vmul.f32 %v2743_v4, %v1661_v51 }
 0x742   :  { %v1683_v12 = vmul.f32 %v2263_v7, %v1677_v9 }
 0x743   :  { %v2745_v21 = vpop.eup %2744 }
 0x744   :  { %v1678_v22 = vmul.f32 %v2745_v21, %v1662_v50  ;;  %v3101_v23 = vadd.f32 %v2264_v10, %v1683_v12  ;;  %v2265_v50 = vld [vmem:[%s3350_s4 + $0x4] ss:$0 sm:$0xff]  ;;  %v2268_v21 = vld [vmem:[%s3350_s4 + $0x5] ss:$0 sm:$0xff] }
 0x746   :  { %v1684_v24 = vmul.f32 %v2263_v7, %v1678_v22  ;;  %2474 = vmatprep.mubr.msk.f32.mxu1 %vm65_vm0, %v3101_v23 }
 0x748   :  { %v3105_v25 = vadd.f32 %v2264_v10, %v1684_v24 }
 0x74a   :  { %2475 = vmatmul.mubr.msk.f32.vlgmr.msra.gmra.mrb[16].mxu1 %vm65_vm0, %v3105_v25 }
 0x74b   :  { %2520 = vmatprep.mubr.msk.f32.mxu1 %vm2763_vm1, %v2760_v11 }
 0x81d   :  { %v2476_v51 = vpop.f32.mrb[16].mxu1 }
 0x81e   :  { %v1773_v52 = vadd.f32 %v2476_v51, %v2265_v50  ;;  %v1767_v53 = vpop.f32.mrb[17].mxu1 }
 0x81f   :  { %v1768_v54 = vadd.f32 %v2265_v50, %v1767_v53 }
 0x820   :  { %v1777_v8 = vmul.f32 %v1773_v52, %v1773_v52 }
 0x821   :  { %v1776_v6 = vmul.f32 %v1768_v54, %v1768_v54 }
 0x822   :  { %v1779_v55 = vmul.f32 %v1777_v8, %v1773_v52 }
 0x823   :  { %v1778_v56 = vmul.f32 %v1776_v6, %v1768_v54  ;;  %v1916_v6 = vrot.slane %v2944_v32, %v2951_v41  ;;  %v2700_v41 = vpack.i.bf16 %v3191_v45, %v3186_v14 }
 0x824   :  { %v1781_v57 = vmul.f32 0.044715, %v1779_v55  ;;  %v1922_v55 = vsub.s32 1, %v2947_v35  ;;  %v2690_v35 = vpack.i.bf16 %v3167_v42, %v3162_v40 }
 0x825   :  { %v1780_v59 = vmul.f32 0.044715, %v1778_v56 }
 0x826   :  { %v1783_v60 = vadd.f32 %v1781_v57, %v1773_v52  ;;  %v1923_v56 = vrot.slane %v2944_v32, %v1922_v55  ;;  %v2670_v57 = vpack.i.bf16 %v3119_v27, %v3114_v26  ;;  %v2685_v32 = vpack.i.bf16 %v3155_v20, %v3150_v38 }
 0x827   :  { %v1782_v61 = vadd.f32 %v1780_v59, %v1768_v54  ;;  %v2680_v59 = vpack.i.bf16 %v3143_v34, %v3138_v33  ;;  %v2695_v26 = vpack.i.bf16 %v3179_v16, %v3172_v43  ;;  %v2705_v27 = vpack.i.bf16 %v3203_v47, %v3198_v0 }
 0x828   :  { %v1785_v58 = vmul.f32 0.7978846, %v1783_v60  ;;  %v2675_v60 = vpack.i.bf16 %v3131_v30, %v3126_v29  ;;  %v31_v29 = vld [vmem:[%s3348_s2 + $0x10] sm:$0xff]  ;;  %v32_v30 = vld [vmem:[%s3348_s2 + $0x28] sm:$0xff]  ;;  %v2773_v33 = vmov 0.0|0.0  }
 0x829   :  { %v1784_v62 = vmul.f32 0.7978846, %v1782_v61  ;;  %2614 = vmatprep.subr.bf16.mxu1 %v2773_v33 }
 0x82a   :  { %2746 = vtanh.f32 %v1785_v58 }
 0x82b   :  { %2748 = vtanh.f32 %v1784_v62 }
 0x834   :  { %v2747_v63 = vpop.eup %2746 }
 0x835   :  { %v2749_v2 = vpop.eup %2748  ;;  %v1789_v5 = vadd.f32 1.0, %v2747_v63 }
 0x836   :  { %v1788_v4 = vadd.f32 1.0, %v2749_v2 }
 0x837   :  { %v1791_v7 = vmul.f32 0.5, %v1789_v5 }
 0x838   :  { %v1790_v9 = vmul.f32 0.5, %v1788_v4 }
 0x839   :  { %v1793_v12 = vmul.f32 %v1791_v7, %v1773_v52 }
 0x83a   :  { %v1792_v10 = vmul.f32 %v1790_v9, %v1768_v54  ;;  %v2269_v9 = vld [vmem:[%s3350_s4 + $0x6] ss:$0 sm:$0xff] }
 0x83c   :  { %2509 = vmatprep.mubr.f32.mxu0 %v1792_v10 }
 0x83d   :  { %2510 = vmatmul.mubr.f32.vlgmr.msra.gmra.mrb[20].mxu0 %v1793_v12 }
 0x910   :  { %v2511_v22 = vpop.f32.mrb[20].mxu0 }
 0x911   :  { %v1870_v24 = vadd.f32 %v2511_v22, %v2268_v21  ;;  %v1864_v28 = vpop.f32.mrb[21].mxu0 }
 0x912   :  { %v1865_v31 = vadd.f32 %v2268_v21, %v1864_v28 }
 0x913   :  { %v1874_v36 = vadd.f32 %v1870_v24, %v3105_v25  ;;  %v2270_v24 = vld [vmem:[%s3350_s4 + $0x7] ss:$0 sm:$0xff] }
 0x914   :  { %v1873_v39 = vadd.f32 %v1865_v31, %v3101_v23 }
 0x915   :  { %v1878_v13 = vsel %vm65_vm0, %v1874_v36, 0.0 }
 0x916   :  { %1879 = vadd.xlane.f32.xlu0 %v1878_v13  ;;  %v1875_v18 = vsel %vm65_vm0, %v1873_v39, 0.0 }
 0x917   :  { %1876 = vadd.xlane.f32.xlu1 %v1875_v18 }
 0x9a3   :  { %v1880_v46 = vpop.xlane.xlu0 %1879 }
 0x9a4   :  { %v1882_v48 = vmul.f32 0.03125, %v1880_v46  ;;  %v1877_v50 = vpop.xlane.xlu1 %1876 }
 0x9a5   :  { %v1881_v51 = vmul.f32 0.03125, %v1877_v50 }
 0x9a6   :  { %v3217_v52 = vsub.f32 %v1874_v36, %v1882_v48 }
 0x9a7   :  { %v3219_v53 = vsub.f32 %v1873_v39, %v1881_v51 }
 0x9a8   :  { %v1886_v54 = vmul.f32 %v3217_v52, %v3217_v52 }
 0x9a9   :  { %v1885_v23 = vmul.f32 %v3219_v53, %v3219_v53 }
 0x9aa   :  { %v1890_v25 = vsel %vm65_vm0, %v1886_v54, 0.0 }
 0x9ab   :  { %1891 = vadd.xlane.f32.xlu0 %v1890_v25  ;;  %v1887_v8 = vsel %vm65_vm0, %v1885_v23, 0.0 }
 0x9ac   :  { %1888 = vadd.xlane.f32.xlu1 %v1887_v8 }
 0x9bd   :  { %1918 = vbcast.lane.b32.xlu1 %v1916_v6, 256 }
 0x9c1   :  { %1925 = vbcast.lane.b32.xlu0 %v1923_v56, 256  ;;  %2671 = vrot.lane.b32.xlu1 %v2670_v57, %s2765_s9 }
 0x9c5   :  { %2681 = vrot.lane.b32.xlu0 %v2680_v59, %s2765_s9  ;;  %2676 = vrot.lane.b32.xlu1 %v2675_v60, %s2765_s9 }
 0x9c9   :  { %2691 = vrot.lane.b32.xlu0 %v2690_v35, %s2765_s9  ;;  %2686 = vrot.lane.b32.xlu1 %v2685_v32, %s2765_s9 }
 0x9cd   :  { %2701 = vrot.lane.b32.xlu0 %v2700_v41, %s2765_s9  ;;  %2696 = vrot.lane.b32.xlu1 %v2695_v26, %s2765_s9 }
 0x9d1   :  { %2188 = vrot.lane.b32.xlu0 %v3002_v37, %s2769_s13  ;;  %2706 = vrot.lane.b32.xlu1 %v2705_v27, %s2765_s9  ;;  %v2615_v37 = vpack.c.bf16 %v32_v30, %v31_v29 }
 0x9d3   :  { %2616 = vmatpush3.bf16.msra.mxu1 %v2615_v37 }
 0x9d4   :  { %2617 = vmatprep.subr.bf16.mxu1 %v2773_v33 }
 0x9d5   :  { %2194 = vrot.lane.b32.xlu0 %v3030_v15, %s2771_s15  ;;  %2191 = vrot.lane.b32.xlu1 %v3017_v44, %s2770_s14  ;;  %v33_v44 = vld [vmem:[%s3348_s2 + $0x40] sm:$0xff]  ;;  %v34_v15 = vld [vmem:[%s3348_s2 + $0x58] sm:$0xff] }
 0x9d9   :  { %2200 = vrot.lane.b32.xlu0 %v3041_v3, %s2772_s25  ;;  %2197 = vrot.lane.b32.xlu1 %v3027_v17, %s2768_s12  ;;  %v2618_v17 = vpack.c.bf16 %v34_v15, %v33_v44 }
 0x9db   :  { %2619 = vmatpush3.bf16.msra.mxu1 %v2618_v17 }
 0x9dc   :  { %2620 = vmatprep.subr.bf16.mxu1 %v2773_v33 }
 0x9dd   :  { %2206 = vrot.lane.b32.xlu0 %v3053_v49, %s2774_s26  ;;  %2203 = vrot.lane.b32.xlu1 %v3036_v1, %s2775_s27 }
 0xa38   :  { %v1892_v3 = vpop.xlane.xlu0 %1891 }
 0xa39   :  { %v1894_v34 = vmul.f32 0.03125, %v1892_v3  ;;  %v1889_v38 = vpop.xlane.xlu1 %1888 }
 0xa3a   :  { %v1893_v20 = vmul.f32 0.03125, %v1889_v38 }
 0xa3b   :  { %v1896_v40 = vadd.f32 1e-12, %v1894_v34 }
 0xa3c   :  { %v1895_v42 = vadd.f32 1e-12, %v1893_v20  ;;  %v1926_v43 = vpop.permute.xlu0 %1925 }
 0xa3d   :  { %2750 = vrsqrt.f32 %v1896_v40  ;;  %v1949_v16 = vrot.slane %v1926_v43, 4  ;;  %v1919_v14 = vpop.permute.xlu1 %1918 }
 0xa3e   :  { %2752 = vrsqrt.f32 %v1895_v42  ;;  %v1943_v45 = vrot.slane %v1919_v14, 4 }
 0xa3f   :  { %v1950_v49 = vadd.f32 %v1949_v16, %v1926_v43 }
 0xa40   :  { %v1944_v0 = vadd.f32 %v1943_v45, %v1919_v14  ;;  %v3281_v47 = vpop.permute.xlu0 %2681 }
 0xa41   :  { %v1951_v1 = vrot.slane %v1950_v49, 2  ;;  %v2672_v61 = vpop.permute.xlu1 %2671 }
 0xa42   :  { %v1945_v58 = vrot.slane %v1944_v0, 2  ;;  %v2674_v15 = vunpack.i.h.bf16 %v2672_v61  ;;  %v2673_v17 = vunpack.i.l.bf16 %v2672_v61 }
 0xa43   :  { %v1952_v62 = vadd.f32 %v1951_v1, %v1950_v49 }
 0xa44   :  { %v1946_v63 = vadd.f32 %v1945_v58, %v1944_v0  ;;  %v3283_v2 = vpop.permute.xlu0 %2691  ;;  %v2621_v16 = vpack.c.bf16 %v2674_v15, %v2673_v17 }
 0xa45   :  { %v3285_v5 = vpop.permute.xlu1 %2676  ;;  %v1953_v4 = vrot.slane %v1952_v62, 1 }
 0xa46   :  { %v1947_v10 = vrot.slane %v1946_v63, 1  ;;  %v2679_v0 = vunpack.i.h.bf16 %v3285_v5  ;;  %v2678_v1 = vunpack.i.l.bf16 %v3285_v5 }
 0xa47   :  { %v2751_v7 = vpop.eup %2750  ;;  %v1954_v39 = vadd.f32 %v1953_v4, %v1952_v62 }
 0xa48   :  { %v2753_v12 = vpop.eup %2752  ;;  %v1900_v21 = vmul.f32 %v2751_v7, %v3217_v52  ;;  %v3291_v22 = vpop.permute.xlu0 %2701  ;;  %v1948_v18 = vadd.f32 %v1947_v10, %v1946_v63  ;;  %v2684_v10 = vunpack.i.h.bf16 %v3281_v47 }
 0xa49   :  { %v1899_v28 = vmul.f32 %v2753_v12, %v3219_v53  ;;  %v3297_v31 = vpop.permute.xlu1 %2686  ;;  %v1956_v54 = vmax.f32 %v1954_v39, 1e-09  ;;  %v2683_v12 = vunpack.i.l.bf16 %v3281_v47  ;;  %v2694_v47 = vunpack.i.h.bf16 %v3283_v2 }
 0xa4a   :  { %v1906_v36 = vmul.f32 %v2269_v9, %v1900_v21  ;;  %v1955_v25 = vmax.f32 %v1948_v18, 1e-09  ;;  %v2624_v21 = vpack.c.bf16 %v2679_v0, %v2678_v1 }
 0xa4b   :  { %v1905_v13 = vmul.f32 %v2269_v9, %v1899_v28  ;;  %2754 = vrcp.f32 %v1956_v54  ;;  %v2627_v5 = vpack.c.bf16 %v2684_v10, %v2683_v12  ;;  %v2688_v28 = vunpack.i.l.bf16 %v3297_v31 }
 0xa4c   :  { %v1912_v46 = vadd.f32 %v2270_v24, %v1906_v36  ;;  %v2189_v48 = vpop.permute.xlu0 %2188  ;;  %2756 = vrcp.f32 %v1955_v25  ;;  %v2693_v36 = vunpack.i.l.bf16 %v3283_v2 }
 0xa4d   :  { %v1911_v50 = vadd.f32 %v2270_v24, %v1905_v13  ;;  %v3299_v51 = vpop.permute.xlu1 %2696  ;;  %v2209_v32 = vsel %vm188_vm2, %v3009_v19, %v2189_v48  ;;  %v2689_v24 = vunpack.i.h.bf16 %v3297_v31  ;;  %v2704_v31 = vunpack.i.h.bf16 %v3291_v22 }
 0xa4e   :  { %v1928_v52 = vmul.f32 %v1926_v43, %v1912_v46  ;;  %v2699_v13 = vunpack.i.h.bf16 %v3299_v51  ;;  %v2698_v18 = vunpack.i.l.bf16 %v3299_v51  ;;  %v2703_v46 = vunpack.i.l.bf16 %v3291_v22  ;;  %v2271_v22 = vld [vmem:[%s3350_s4 + $0x8] ss:$0 sm:$0xff] }
 0xa4f   :  { %v1927_v23 = vmul.f32 %v1919_v14, %v1911_v50  ;;  %v2630_v39 = vpack.c.bf16 %v2689_v24, %v2688_v28 }
 0xa50   :  { %v1936_v8 = vsel %vm65_vm0, %v1928_v52, 0.0  ;;  %v2195_v57 = vpop.permute.xlu0 %2194  ;;  %v2636_v48 = vpack.c.bf16 %v2699_v13, %v2698_v18  ;;  %v2639_v2 = vpack.c.bf16 %v2704_v31, %v2703_v46 }
 0xa51   :  { %v1937_v6 = vrot.slane %v1936_v8, 4  ;;  %v1929_v53 = vsel %vm65_vm0, %v1927_v23, 0.0  ;;  %v3303_v55 = vpop.permute.xlu1 %2706 }
 0xa52   :  { %v1930_v56 = vrot.slane %v1929_v53, 4  ;;  %v2709_v50 = vunpack.i.h.bf16 %v3303_v55  ;;  %v2708_v52 = vunpack.i.l.bf16 %v3303_v55 }
 0xa53   :  { %v1938_v59 = vadd.f32 %v1937_v6, %v1936_v8  ;;  %v2273_v6 = vld [vmem:[%s3350_s4 + $0x9] ss:$0 sm:$0xff] }
 0xa54   :  { %v1931_v60 = vadd.f32 %v1930_v56, %v1929_v53  ;;  %v2201_v37 = vpop.permute.xlu0 %2200  ;;  %v2642_v51 = vpack.c.bf16 %v2709_v50, %v2708_v52 }
 0xa55   :  { %v1939_v35 = vrot.slane %v1938_v59, 2  ;;  %v2192_v41 = vpop.permute.xlu1 %2191  ;;  %v2755_v19 = vpop.eup %2754 }
 0xa56   :  { %v1932_v26 = vrot.slane %v1931_v60, 2  ;;  %v2210_v27 = vsel %vm1543_vm3, %v2209_v32, %v2192_v41  ;;  %v2757_v43 = vpop.eup %2756 }
 0xa57   :  { %v1940_v29 = vadd.f32 %v1939_v35, %v1938_v59  ;;  %v2211_v3 = vsel %vm1546_vm4, %v2210_v27, %v2195_v57 }
 0xa58   :  { %v1933_v30 = vadd.f32 %v1932_v26, %v1931_v60  ;;  %v2207_v61 = vpop.permute.xlu0 %2206 }
 0xa59   :  { %v1941_v44 = vrot.slane %v1940_v29, 1  ;;  %v2198_v34 = vpop.permute.xlu1 %2197 }
 0xa5a   :  { %v1934_v38 = vrot.slane %v1933_v30, 1  ;;  %v2212_v20 = vsel %vm65_vm0, %v2211_v3, %v2198_v34 }
 0xa5b   :  { %v1942_v40 = vadd.f32 %v1941_v44, %v1940_v29  ;;  %v2214_v14 = vsel %vm2213_vm5, %v2212_v20, %v2201_v37 }
 0xa5c   :  { %v1935_v42 = vadd.f32 %v1934_v38, %v1933_v30 }
 0xa5d   :  { %v2204_v45 = vpop.permute.xlu1 %2203  ;;  %v1960_v49 = vmul.f32 %v2755_v19, %v1942_v40 }
 0xa5e   :  { %v2216_v58 = vsel %vm2215_vm6, %v2214_v14, %v2204_v45  ;;  %v1959_v62 = vmul.f32 %v2757_v43, %v1935_v42 }
 0xa5f   :  { %v2218_v63 = vsel %vm2217_vm7, %v2216_v58, %v2207_v61 }
 0xa60   :  { %v2220_v4 = vsel %vm2219_vm8, %v2218_v63, 0.0  ;;  %v1968_v7 = vsel %vm1967_vm9, %v1960_v49, %v1959_v62 }
 0xa61   :  { %v2222_v9 = vrot.slane %v2220_v4, 6  ;;  %2521 = vmatmul.mubr.msk.f32.vlgmr.msra.gmra.mrb[18].mxu1 %vm65_vm0, %v1968_v7 }
 0xa62   :  { %2622 = vmatpush3.bf16.msra.mxu1 %v2621_v16  ;;  %2555 = vmatprep.mubr.msk.f32.mxu1 %vm2763_vm1, %v2760_v11  ;;  %v2633_v11 = vpack.c.bf16 %v2694_v47, %v2693_v36 }
 0xa63   :  { %2623 = vmatprep.subr.bf16.mxu1 %v2773_v33  ;;  %2227 = vst [vmem:[%s3353_s5 + $0x8] sm:$0x3] %v2222_v9 }
 0xa66   :  { %2625 = vmatpush3.bf16.msra.mxu1 %v2624_v21 }
 0xa67   :  { %2626 = vmatprep.subr.bf16.mxu1 %v2773_v33 }
 0xa6a   :  { %2628 = vmatpush3.bf16.msra.mxu1 %v2627_v5 }
 0xa6b   :  { %2629 = vmatprep.subr.bf16.mxu1 %v2773_v33 }
 0xa6e   :  { %2631 = vmatpush3.bf16.msra.mxu1 %v2630_v39 }
 0xa6f   :  { %2632 = vmatprep.subr.bf16.mxu1 %v2773_v33 }
 0xa72   :  { %2634 = vmatpush3.bf16.msra.mxu1 %v2633_v11 }
 0xa73   :  { %2635 = vmatprep.subr.bf16.mxu1 %v2773_v33 }
 0xa76   :  { %2637 = vmatpush3.bf16.msra.mxu1 %v2636_v48 }
 0xa77   :  { %2638 = vmatprep.subr.bf16.mxu1 %v2773_v33 }
 0xa7a   :  { %2640 = vmatpush3.bf16.msra.mxu1 %v2639_v2 }
 0xa7b   :  { %2641 = vmatprep.subr.bf16.mxu1 %v2773_v33 }
 0xa7e   :  { %2643 = vmatpush3.bf16.msra.mxu1 %v2642_v51 }
 0xb34   :  { %v2037_v54 = vpop.f32.mrb[18].mxu1 }
 0xb35   :  { %v2038_v23 = vadd.f32 %v2271_v22, %v2037_v54  ;;  %v2522_v25 = vpop.f32.mrb[19].mxu1 }
 0xb37   :  { %2758 = vtanh.f32 %v2038_v23 }
 0xb41   :  { %v2759_v8 = vpop.eup %2758 }
 0xb42   :  { %2556 = vmatmul.mubr.f32.vlgmr.msra.gmra.mrb[20].mxu1 %v2759_v8 }
 0xc15   :  { %v2176_v53 = vpop.f32.mrb[20].mxu1 }
 0xc16   :  { %v2177_v55 = vadd.f32 %v2273_v6, %v2176_v53  ;;  %v2557_v56 = vpop.f32.mrb[21].mxu1 }
 0xc18   :  { %2182 = vrot.lane.b32.xlu1 %v2177_v55, %s2768_s12 }
 0xc8a   :  { %v2183_v33 = vpop.permute.xlu1 %2182 }
 0xc8b   :  { %v2185_v57 = vsel %vm65_vm0, %v1968_v7, %v2183_v33 }
 0xc8c   :  { %v2187_v59 = vsel %vm2186_vm10, %v2185_v57, 0.0 }
 0xc8d   :  { %v2225_v60 = vsel %vm2224_vm11, %v2187_v59, %v2222_v9 }
 0xc8e   :  { %2226 = vst [vmem:[%s3353_s5] sm:$0xff] %v2225_v60 }

</bundles_post_ra>
